<compile_context>
chip_gen: v6e
topology: v6e:2x2x1
jax: 0.10.0
libtpu: 0.0.40
codegen_flags: <defaults>
</compile_context>

<pallas_src>
import jax
import jax.numpy as jnp
import numpy as np
from jax.experimental import pallas as pl
from jax.experimental.pallas import tpu as pltpu

C_PAD = 128   # lane-dense padded fused channel count (3 * out_channels -> 128)
N_PAD = 128   # lane-dense padded class count (num_class -> 128)


# ---------------------------------------------------------------------------
# Fused Pallas kernel (one batch element per grid step)
# ---------------------------------------------------------------------------
def textcnn_fused_kernel(ids_ref, table_ref, wtap_ref, bconv_ref, mask_ref,
                         wfc_ref, bfc_ref, out_ref, emb_buf, row_sems):
    """Fused TextCNN forward (eval mode) for one batch element.

    ids_ref  : SMEM (B*L_pad,) int32   token ids (scalar prefetch), tail-padded
    table_ref: HBM  (V, D)     f32     embedding table (memory_space=pl.ANY)
    wtap_ref : VMEM (k_max, D, C_PAD)  bf16 per-tap fused conv weight
    bconv_ref: VMEM (1, C_PAD) f32     fused conv bias
    mask_ref : VMEM (l_out, C_PAD) f32 per-branch validity mask (1/0)
    wfc_ref  : VMEM (C_PAD, N_PAD) f32 fc1 weight (rows in fused channel order)
    bfc_ref  : VMEM (1, N_PAD) f32     fc1 bias (zero-padded)
    out_ref  : VMEM (1, 1, N_PAD) f32  logits block for this batch element
    emb_buf  : VMEM (L_pad, D) f32     gathered embedding rows (scratch)
    row_sems : DMA semaphores (L_pad,)
    """
    k_max, _, c_pad = wtap_ref.shape
    l_pad = emb_buf.shape[0]
    l_out = l_pad - k_max + 1
    b = pl.program_id(0)

    # --- embedding gather: DMA the L_pad needed rows from the HBM table ------
    base = b * l_pad
    for t in range(l_pad):                      # static unroll; l_pad is small
        row = ids_ref[base + t]
        pltpu.make_async_copy(table_ref.at[pl.ds(row, 1), :],
                              emb_buf.at[pl.ds(t, 1), :],
                              row_sems.at[t]).start()
    for t in range(l_pad):
        pltpu.make_async_copy(table_ref.at[pl.ds(0, 1), :],
                              emb_buf.at[pl.ds(t, 1), :],
                              row_sems.at[t]).wait()
    # TODO(synk): for long sequences, chunk this gather (pl.loop + a small
    # semaphore ring / multi-row DMAs) instead of a fully unrolled row list.

    # --- conv via per-tap accumulation (no materialized im2col) --------------
    # Taps j >= K of a branch have zero weight, so garbage embedding rows at
    # padded tail positions contribute exactly 0 to valid output positions.
    acc = jnp.zeros((l_out, c_pad), jnp.float32)
    for j in range(k_max):                      # k_max is tiny and static
        win = emb_buf[j:j + l_out, :].astype(wtap_ref.dtype)
        acc = acc + jnp.dot(win, wtap_ref[j],
                            preferred_element_type=jnp.float32)

    conv = jnp.maximum(acc + bconv_ref[...], 0.0)     # bias + ReLU (f32 VPU)
    conv = conv * mask_ref[...]                       # zero invalid tail positions
    pooled = jnp.max(conv, axis=0, keepdims=True)     # global max pool -> (1, C_PAD)

    # --- dropout is identity at inference; fc1 (lane-dense padded N) ---------
    # TODO(synk): training-mode dropout (Bernoulli mask) not implemented.
    logits = jnp.dot(pooled, wfc_ref[...],
                     preferred_element_type=jnp.float32) + bfc_ref[...]
    out_ref[...] = logits[None]                       # (1, 1, N_PAD)


def textcnn_pallas(ids_flat, table, w_tap, b_conv, mask, w_fc, b_fc, *,
                   batch, l_pad):
    k_max, D, c_pad = w_tap.shape
    l_out = mask.shape[0]
    n_pad = w_fc.shape[1]
    assert l_out == l_pad - k_max + 1

    blocked = (w_tap, b_conv, mask, w_fc, b_fc)
    blocked_bytes = sum(int(np.prod(a.shape)) * a.dtype.itemsize for a in blocked)
    resident = (2 * blocked_bytes                                   # double-buffered inputs
                + l_pad * D * table.dtype.itemsize                  # emb scratch
                + 3 * l_out * c_pad * 4                             # f32 acc/conv intermediates
                + 2 * n_pad * 4)                                    # out block
    vmem_limit = int(min(max(4 * resident, 16 << 20), 64 << 20))

    cost = pl.CostEstimate(
        flops=int(2 * batch * (l_out * k_max * D * c_pad + c_pad * n_pad)),
        transcendentals=0,
        bytes_accessed=int(ids_flat.size * 4
                           + batch * l_pad * D * table.dtype.itemsize  # gathered rows
                           + blocked_bytes
                           + batch * n_pad * 4),
    )

    grid_spec = pltpu.PrefetchScalarGridSpec(
        num_scalar_prefetch=1,                     # ids -> SMEM
        grid=(batch,),
        in_specs=[
            pl.BlockSpec(memory_space=pl.ANY),                          # table stays in HBM
            pl.BlockSpec((k_max, D, c_pad), lambda b, ids: (0, 0, 0)),  # per-tap conv weight
            pl.BlockSpec((1, c_pad), lambda b, ids: (0, 0)),            # conv bias
            pl.BlockSpec((l_out, c_pad), lambda b, ids: (0, 0)),        # validity mask
            pl.BlockSpec((c_pad, n_pad), lambda b, ids: (0, 0)),        # fc1 weight
            pl.BlockSpec((1, n_pad), lambda b, ids: (0, 0)),            # fc1 bias
        ],
        out_specs=pl.BlockSpec((1, 1, n_pad), lambda b, ids: (b, 0, 0)),
        scratch_shapes=[
            pltpu.VMEM((l_pad, D), table.dtype),       # gathered embedding rows
            pltpu.SemaphoreType.DMA((l_pad,)),         # one DMA sem per row
        ],
    )

    return pl.pallas_call(
        textcnn_fused_kernel,
        out_shape=jax.ShapeDtypeStruct((batch, 1, n_pad), jnp.float32),
        grid_spec=grid_spec,
        compiler_params=pltpu.CompilerParams(
            dimension_semantics=("parallel",),         # megacore batch split on v7x
            vmem_limit_bytes=vmem_limit,
        ),
        cost_estimate=cost,
    )(ids_flat, table, w_tap, b_conv, mask, w_fc, b_fc)


# ---------------------------------------------------------------------------
# Parameter handling (PyTorch layout -> fused kernel layout)
# ---------------------------------------------------------------------------
def init_pt_params(key, num_embed, dim_embed, num_class, out_channels, kernel_sizes):
    """Parameters in PyTorch layout: Conv2d weight (C,1,K,D), Linear weight (N,F)."""
    n_k = len(kernel_sizes)
    ks = jax.random.split(key, 2 * n_k + 3)
    p = {"embed": jax.random.normal(ks[0], (num_embed, dim_embed), jnp.float32) * 0.1,
         "convs": []}
    for i, k in enumerate(kernel_sizes):
        w = jax.random.normal(ks[1 + 2 * i], (out_channels, 1, k, dim_embed), jnp.float32) * 0.1
        b = jax.random.normal(ks[2 + 2 * i], (out_channels,), jnp.float32) * 0.1
        p["convs"].append((w, b))
    p["fc1_w"] = jax.random.normal(ks[-2], (num_class, n_k * out_channels), jnp.float32) * 0.1
    p["fc1_b"] = jax.random.normal(ks[-1], (num_class,), jnp.float32) * 0.1
    return p


def prepare_fused_params(pt, seq_len, c_pad=C_PAD, n_pad=N_PAD,
                         compute_dtype=jnp.bfloat16):
    """One-time conversion to the fused kernel layout (branch-major channels)."""
    convs = pt["convs"]
    n_k = len(convs)
    C = convs[0][0].shape[0]
    k_sizes = [w.shape[2] for w, _ in convs]
    k_max, k_min = max(k_sizes), min(k_sizes)
    l_out = seq_len - k_min + 1
    c_total = n_k * C
    num_class = pt["fc1_w"].shape[0]
    assert c_total <= c_pad and num_class <= n_pad

    taps, biases, valid = [], [], []
    for w, b in convs:                                   # w: (C, 1, K, D)
        K = w.shape[2]
        wk = jnp.transpose(w[:, 0], (1, 2, 0))           # (K, D, C)
        taps.append(jnp.pad(wk, ((0, k_max - K), (0, 0), (0, 0))))  # zero-pad taps
        biases.append(b)
        valid.append(jnp.full((C,), seq_len - K + 1, jnp.int32))
    w_tap = jnp.pad(jnp.concatenate(taps, axis=2),
                    ((0, 0), (0, 0), (0, c_pad - c_total)))          # (k_max, D, c_pad)
    b_conv = jnp.pad(jnp.concatenate(biases), (0, c_pad - c_total))
    valid = jnp.pad(jnp.concatenate(valid), (0, c_pad - c_total), constant_values=0)

    # Precomputed multiplicative validity mask (values are >= 0 after ReLU,
    # so zeroing invalid tail positions cannot change the max).
    mask = (jnp.arange(l_out)[:, None] < valid[None, :]).astype(jnp.float32)

    # PyTorch flatten order is feat[c * n_k + i]; fused pooled order is [i * C + c].
    w_fc = pt["fc1_w"].T.reshape(C, n_k, num_class)                  # rows (c, i)
    w_fc = jnp.transpose(w_fc, (1, 0, 2)).reshape(c_total, num_class)  # rows (i, c)
    w_fc = jnp.pad(w_fc, ((0, c_pad - c_total), (0, n_pad - num_class)))
    b_fc = jnp.pad(pt["fc1_b"], (0, n_pad - num_class))

    return {
        "table": pt["embed"].astype(jnp.float32),          # (V, D) f32, stays in HBM
        "w_tap": w_tap.astype(compute_dtype),              # (k_max, D, c_pad) bf16
        "b_conv": b_conv.reshape(1, c_pad).astype(jnp.float32),
        "mask": mask,                                      # (l_out, c_pad) f32
        "w_fc": w_fc.astype(jnp.float32),                  # (c_pad, n_pad)
        "b_fc": b_fc.reshape(1, n_pad).astype(jnp.float32),
    }


def build_forward(kernel_sizes, num_class, num_embed):
    k_max, k_min = max(kernel_sizes), min(kernel_sizes)
    tail = k_max - k_min   # extra ids so one l_out covers the smallest kernel's range

    @jax.jit
    def forward(fused, token_ids):
        B, L = token_ids.shape
        l_pad = L + tail
        # Tail-pad ids with a valid token (0); any conv position touching a
        # padded row is zeroed by the validity mask, so the value is irrelevant.
        ids = jnp.pad(token_ids.astype(jnp.int32), ((0, 0), (0, tail)))
        ids = jnp.clip(ids, 0, num_embed - 1).reshape(-1)          # (B * l_pad,)
        logits = textcnn_pallas(ids, fused["table"], fused["w_tap"],
                                fused["b_conv"], fused["mask"],
                                fused["w_fc"], fused["b_fc"],
                                batch=B, l_pad=l_pad)
        return logits[:, 0, :num_class]                            # drop lane padding

    return forward


# ---------------------------------------------------------------------------
# Pure-JAX reference (exact PyTorch TextCNN semantics, f32)
# ---------------------------------------------------------------------------
def textcnn_reference(pt, token_ids):
    emb = jnp.take(pt["embed"], token_ids, axis=0)           # (B, L, D)
    B, L, _ = emb.shape
    outs = []
    for w, b in pt["convs"]:                                 # w: (C, 1, K, D)
        C, _, K, _ = w.shape
        lout = L - K + 1
        conv = jnp.zeros((B, C, lout), jnp.float32)
        for j in range(K):
            conv = conv + jnp.einsum("bld,cd->bcl", emb[:, j:j + lout, :], w[:, 0, j, :])
        conv = jax.nn.relu(conv + b[None, :, None])
        outs.append(jnp.max(conv, axis=2))                   # (B, C)
    feat = jnp.stack(outs, axis=2).reshape(B, -1)            # torch.cat(dim=2) + view
    return feat @ pt["fc1_w"].T + pt["fc1_b"]                # dropout = identity (eval)


if __name__ == "__main__":
    # Small, module-consistent shapes.
    num_embed = 50      # vocabulary size
    dim_embed = 32      # embedding dim
    num_class = 4
    p_dropout = 0.5     # unused at inference
    in_channels = 1
    out_channels = 8
    kernel_sizes = [3, 4, 5]
    strides = 1
    B, L = 2, 16

    key = jax.random.PRNGKey(0)
    pkey, xkey = jax.random.split(key)
    pt_params = init_pt_params(pkey, num_embed, dim_embed, num_class,
                               out_channels, kernel_sizes)
    token_ids = jax.random.randint(xkey, (B, L), 0, num_embed, dtype=jnp.int32)

    fused_params = prepare_fused_params(pt_params, L)
    forward = build_forward(kernel_sizes, num_class, num_embed)

    out = jax.block_until_ready(forward(fused_params, token_ids))
    assert out.shape == (B, num_class), out.shape

    ref = jax.block_until_ready(textcnn_reference(pt_params, token_ids))
    np.testing.assert_allclose(np.asarray(out), np.asarray(ref), atol=2e-2, rtol=2e-2)

    print("KERNEL_OK")
</pallas_src>

<mosaic_0001>
module attributes {stable_mosaic.version = 11 : i64} {
  func.func @textcnn_fused_kernel(%arg0: i32, %arg1: memref<36xi32, #tpu.memory_space<smem>>, %arg2: memref<50x32xf32, #tpu.memory_space<any>>, %arg3: memref<5x32x128xbf16, #tpu.memory_space<vmem>>, %arg4: memref<1x128xf32, #tpu.memory_space<vmem>>, %arg5: memref<14x128xf32, #tpu.memory_space<vmem>>, %arg6: memref<128x128xf32, #tpu.memory_space<vmem>>, %arg7: memref<1x128xf32, #tpu.memory_space<vmem>>, %arg8: memref<1x1x128xf32, #tpu.memory_space<vmem>>, %arg9: memref<18x32xf32, #tpu.memory_space<vmem>>, %arg10: memref<18x!tpu.dma_semaphore, #tpu.memory_space<semaphore_mem>>) attributes {dimension_semantics = [#tpu.dimension_semantics<parallel>], iteration_bounds = array<i64: 2>, scalar_prefetch = 1 : i64, scratch_operands = 2 : i64, tpu.core_type = #tpu.core_type<tc>, window_params = [{}, {pipeline_mode = #tpu.pipeline_mode<synchronous>, transform_indices = @transform_1, window_bounds = array<i64: 5, 32, 128>}, {pipeline_mode = #tpu.pipeline_mode<synchronous>, transform_indices = @transform_2, window_bounds = array<i64: 1, 128>}, {pipeline_mode = #tpu.pipeline_mode<synchronous>, transform_indices = @transform_3, window_bounds = array<i64: 14, 128>}, {pipeline_mode = #tpu.pipeline_mode<synchronous>, transform_indices = @transform_4, window_bounds = array<i64: 128, 128>}, {pipeline_mode = #tpu.pipeline_mode<synchronous>, transform_indices = @transform_5, window_bounds = array<i64: 1, 128>}, {transform_indices = @transform_6, window_bounds = array<i64: 1, 1, 128>}]} {
    %c18_i32 = arith.constant 18 : i32
    %0 = arith.muli %arg0, %c18_i32 : i32
    %c0_i32 = arith.constant 0 : i32
    %1 = arith.addi %0, %c0_i32 : i32
    %2 = arith.index_cast %1 : i32 to index
    %3 = memref.load %arg1[%2] : memref<36xi32, #tpu.memory_space<smem>>
    %c0_i32_0 = arith.constant 0 : i32
    %c0_i32_1 = arith.constant 0 : i32
    %4 = tpu.memref_slice %arg2[%3, %c0_i32_1] : memref<50x32xf32, #tpu.memory_space<any>> -> memref<1x32xf32, #tpu.memory_space<any>>
    %c0_i32_2 = arith.constant 0 : i32
    %c0_i32_3 = arith.constant 0 : i32
    %5 = tpu.memref_slice %arg9[%c0_i32_2, %c0_i32_3] : memref<18x32xf32, #tpu.memory_space<vmem>> -> memref<1x32xf32, #tpu.memory_space<vmem>>
    %6 = tpu.memref_slice %arg10[%c0_i32_0] : memref<18x!tpu.dma_semaphore, #tpu.memory_space<semaphore_mem>> -> memref<1x!tpu.dma_semaphore, #tpu.memory_space<semaphore_mem>>
    %7 = tpu.memref_squeeze %6 : memref<1x!tpu.dma_semaphore, #tpu.memory_space<semaphore_mem>> -> memref<!tpu.dma_semaphore, #tpu.memory_space<semaphore_mem>>
    tpu.enqueue_dma source(%4 : memref<1x32xf32, #tpu.memory_space<any>>) target(%5 : memref<1x32xf32, #tpu.memory_space<vmem>>) target_semaphore(%7 : memref<!tpu.dma_semaphore, #tpu.memory_space<semaphore_mem>>)
    %c1_i32 = arith.constant 1 : i32
    %8 = arith.addi %0, %c1_i32 : i32
    %9 = arith.index_cast %8 : i32 to index
    %10 = memref.load %arg1[%9] : memref<36xi32, #tpu.memory_space<smem>>
    %c1_i32_4 = arith.constant 1 : i32
    %c0_i32_5 = arith.constant 0 : i32
    %11 = tpu.memref_slice %arg2[%10, %c0_i32_5] : memref<50x32xf32, #tpu.memory_space<any>> -> memref<1x32xf32, #tpu.memory_space<any>>
    %c1_i32_6 = arith.constant 1 : i32
    %c0_i32_7 = arith.constant 0 : i32
    %12 = tpu.memref_slice %arg9[%c1_i32_6, %c0_i32_7] : memref<18x32xf32, #tpu.memory_space<vmem>> -> memref<1x32xf32, #tpu.memory_space<vmem>>
    %13 = tpu.memref_slice %arg10[%c1_i32_4] : memref<18x!tpu.dma_semaphore, #tpu.memory_space<semaphore_mem>> -> memref<1x!tpu.dma_semaphore, #tpu.memory_space<semaphore_mem>>
    %14 = tpu.memref_squeeze %13 : memref<1x!tpu.dma_semaphore, #tpu.memory_space<semaphore_mem>> -> memref<!tpu.dma_semaphore, #tpu.memory_space<semaphore_mem>>
    tpu.enqueue_dma source(%11 : memref<1x32xf32, #tpu.memory_space<any>>) target(%12 : memref<1x32xf32, #tpu.memory_space<vmem>>) target_semaphore(%14 : memref<!tpu.dma_semaphore, #tpu.memory_space<semaphore_mem>>)
    %c2_i32 = arith.constant 2 : i32
    %15 = arith.addi %0, %c2_i32 : i32
    %16 = arith.index_cast %15 : i32 to index
    %17 = memref.load %arg1[%16] : memref<36xi32, #tpu.memory_space<smem>>
    %c2_i32_8 = arith.constant 2 : i32
    %c0_i32_9 = arith.constant 0 : i32
    %18 = tpu.memref_slice %arg2[%17, %c0_i32_9] : memref<50x32xf32, #tpu.memory_space<any>> -> memref<1x32xf32, #tpu.memory_space<any>>
    %c2_i32_10 = arith.constant 2 : i32
    %c0_i32_11 = arith.constant 0 : i32
    %19 = tpu.memref_slice %arg9[%c2_i32_10, %c0_i32_11] : memref<18x32xf32, #tpu.memory_space<vmem>> -> memref<1x32xf32, #tpu.memory_space<vmem>>
    %20 = tpu.memref_slice %arg10[%c2_i32_8] : memref<18x!tpu.dma_semaphore, #tpu.memory_space<semaphore_mem>> -> memref<1x!tpu.dma_semaphore, #tpu.memory_space<semaphore_mem>>
    %21 = tpu.memref_squeeze %20 : memref<1x!tpu.dma_semaphore, #tpu.memory_space<semaphore_mem>> -> memref<!tpu.dma_semaphore, #tpu.memory_space<semaphore_mem>>
    tpu.enqueue_dma source(%18 : memref<1x32xf32, #tpu.memory_space<any>>) target(%19 : memref<1x32xf32, #tpu.memory_space<vmem>>) target_semaphore(%21 : memref<!tpu.dma_semaphore, #tpu.memory_space<semaphore_mem>>)
    %c3_i32 = arith.constant 3 : i32
    %22 = arith.addi %0, %c3_i32 : i32
    %23 = arith.index_cast %22 : i32 to index
    %24 = memref.load %arg1[%23] : memref<36xi32, #tpu.memory_space<smem>>
    %c3_i32_12 = arith.constant 3 : i32
    %c0_i32_13 = arith.constant 0 : i32
    %25 = tpu.memref_slice %arg2[%24, %c0_i32_13] : memref<50x32xf32, #tpu.memory_space<any>> -> memref<1x32xf32, #tpu.memory_space<any>>
    %c3_i32_14 = arith.constant 3 : i32
    %c0_i32_15 = arith.constant 0 : i32
    %26 = tpu.memref_slice %arg9[%c3_i32_14, %c0_i32_15] : memref<18x32xf32, #tpu.memory_space<vmem>> -> memref<1x32xf32, #tpu.memory_space<vmem>>
    %27 = tpu.memref_slice %arg10[%c3_i32_12] : memref<18x!tpu.dma_semaphore, #tpu.memory_space<semaphore_mem>> -> memref<1x!tpu.dma_semaphore, #tpu.memory_space<semaphore_mem>>
    %28 = tpu.memref_squeeze %27 : memref<1x!tpu.dma_semaphore, #tpu.memory_space<semaphore_mem>> -> memref<!tpu.dma_semaphore, #tpu.memory_space<semaphore_mem>>
    tpu.enqueue_dma source(%25 : memref<1x32xf32, #tpu.memory_space<any>>) target(%26 : memref<1x32xf32, #tpu.memory_space<vmem>>) target_semaphore(%28 : memref<!tpu.dma_semaphore, #tpu.memory_space<semaphore_mem>>)
    %c4_i32 = arith.constant 4 : i32
    %29 = arith.addi %0, %c4_i32 : i32
    %30 = arith.index_cast %29 : i32 to index
    %31 = memref.load %arg1[%30] : memref<36xi32, #tpu.memory_space<smem>>
    %c4_i32_16 = arith.constant 4 : i32
    %c0_i32_17 = arith.constant 0 : i32
    %32 = tpu.memref_slice %arg2[%31, %c0_i32_17] : memref<50x32xf32, #tpu.memory_space<any>> -> memref<1x32xf32, #tpu.memory_space<any>>
    %c4_i32_18 = arith.constant 4 : i32
    %c0_i32_19 = arith.constant 0 : i32
    %33 = tpu.memref_slice %arg9[%c4_i32_18, %c0_i32_19] : memref<18x32xf32, #tpu.memory_space<vmem>> -> memref<1x32xf32, #tpu.memory_space<vmem>>
    %34 = tpu.memref_slice %arg10[%c4_i32_16] : memref<18x!tpu.dma_semaphore, #tpu.memory_space<semaphore_mem>> -> memref<1x!tpu.dma_semaphore, #tpu.memory_space<semaphore_mem>>
    %35 = tpu.memref_squeeze %34 : memref<1x!tpu.dma_semaphore, #tpu.memory_space<semaphore_mem>> -> memref<!tpu.dma_semaphore, #tpu.memory_space<semaphore_mem>>
    tpu.enqueue_dma source(%32 : memref<1x32xf32, #tpu.memory_space<any>>) target(%33 : memref<1x32xf32, #tpu.memory_space<vmem>>) target_semaphore(%35 : memref<!tpu.dma_semaphore, #tpu.memory_space<semaphore_mem>>)
    %c5_i32 = arith.constant 5 : i32
    %36 = arith.addi %0, %c5_i32 : i32
    %37 = arith.index_cast %36 : i32 to index
    %38 = memref.load %arg1[%37] : memref<36xi32, #tpu.memory_space<smem>>
    %c5_i32_20 = arith.constant 5 : i32
    %c0_i32_21 = arith.constant 0 : i32
    %39 = tpu.memref_slice %arg2[%38, %c0_i32_21] : memref<50x32xf32, #tpu.memory_space<any>> -> memref<1x32xf32, #tpu.memory_space<any>>
    %c5_i32_22 = arith.constant 5 : i32
    %c0_i32_23 = arith.constant 0 : i32
    %40 = tpu.memref_slice %arg9[%c5_i32_22, %c0_i32_23] : memref<18x32xf32, #tpu.memory_space<vmem>> -> memref<1x32xf32, #tpu.memory_space<vmem>>
    %41 = tpu.memref_slice %arg10[%c5_i32_20] : memref<18x!tpu.dma_semaphore, #tpu.memory_space<semaphore_mem>> -> memref<1x!tpu.dma_semaphore, #tpu.memory_space<semaphore_mem>>
    %42 = tpu.memref_squeeze %41 : memref<1x!tpu.dma_semaphore, #tpu.memory_space<semaphore_mem>> -> memref<!tpu.dma_semaphore, #tpu.memory_space<semaphore_mem>>
    tpu.enqueue_dma source(%39 : memref<1x32xf32, #tpu.memory_space<any>>) target(%40 : memref<1x32xf32, #tpu.memory_space<vmem>>) target_semaphore(%42 : memref<!tpu.dma_semaphore, #tpu.memory_space<semaphore_mem>>)
    %c6_i32 = arith.constant 6 : i32
    %43 = arith.addi %0, %c6_i32 : i32
    %44 = arith.index_cast %43 : i32 to index
    %45 = memref.load %arg1[%44] : memref<36xi32, #tpu.memory_space<smem>>
    %c6_i32_24 = arith.constant 6 : i32
    %c0_i32_25 = arith.constant 0 : i32
    %46 = tpu.memref_slice %arg2[%45, %c0_i32_25] : memref<50x32xf32, #tpu.memory_space<any>> -> memref<1x32xf32, #tpu.memory_space<any>>
    %c6_i32_26 = arith.constant 6 : i32
    %c0_i32_27 = arith.constant 0 : i32
    %47 = tpu.memref_slice %arg9[%c6_i32_26, %c0_i32_27] : memref<18x32xf32, #tpu.memory_space<vmem>> -> memref<1x32xf32, #tpu.memory_space<vmem>>
    %48 = tpu.memref_slice %arg10[%c6_i32_24] : memref<18x!tpu.dma_semaphore, #tpu.memory_space<semaphore_mem>> -> memref<1x!tpu.dma_semaphore, #tpu.memory_space<semaphore_mem>>
    %49 = tpu.memref_squeeze %48 : memref<1x!tpu.dma_semaphore, #tpu.memory_space<semaphore_mem>> -> memref<!tpu.dma_semaphore, #tpu.memory_space<semaphore_mem>>
    tpu.enqueue_dma source(%46 : memref<1x32xf32, #tpu.memory_space<any>>) target(%47 : memref<1x32xf32, #tpu.memory_space<vmem>>) target_semaphore(%49 : memref<!tpu.dma_semaphore, #tpu.memory_space<semaphore_mem>>)
    %c7_i32 = arith.constant 7 : i32
    %50 = arith.addi %0, %c7_i32 : i32
    %51 = arith.index_cast %50 : i32 to index
    %52 = memref.load %arg1[%51] : memref<36xi32, #tpu.memory_space<smem>>
    %c7_i32_28 = arith.constant 7 : i32
    %c0_i32_29 = arith.constant 0 : i32
    %53 = tpu.memref_slice %arg2[%52, %c0_i32_29] : memref<50x32xf32, #tpu.memory_space<any>> -> memref<1x32xf32, #tpu.memory_space<any>>
    %c7_i32_30 = arith.constant 7 : i32
    %c0_i32_31 = arith.constant 0 : i32
    %54 = tpu.memref_slice %arg9[%c7_i32_30, %c0_i32_31] : memref<18x32xf32, #tpu.memory_space<vmem>> -> memref<1x32xf32, #tpu.memory_space<vmem>>
    %55 = tpu.memref_slice %arg10[%c7_i32_28] : memref<18x!tpu.dma_semaphore, #tpu.memory_space<semaphore_mem>> -> memref<1x!tpu.dma_semaphore, #tpu.memory_space<semaphore_mem>>
    %56 = tpu.memref_squeeze %55 : memref<1x!tpu.dma_semaphore, #tpu.memory_space<semaphore_mem>> -> memref<!tpu.dma_semaphore, #tpu.memory_space<semaphore_mem>>
    tpu.enqueue_dma source(%53 : memref<1x32xf32, #tpu.memory_space<any>>) target(%54 : memref<1x32xf32, #tpu.memory_space<vmem>>) target_semaphore(%56 : memref<!tpu.dma_semaphore, #tpu.memory_space<semaphore_mem>>)
    %c8_i32 = arith.constant 8 : i32
    %57 = arith.addi %0, %c8_i32 : i32
    %58 = arith.index_cast %57 : i32 to index
    %59 = memref.load %arg1[%58] : memref<36xi32, #tpu.memory_space<smem>>
    %c8_i32_32 = arith.constant 8 : i32
    %c0_i32_33 = arith.constant 0 : i32
    %60 = tpu.memref_slice %arg2[%59, %c0_i32_33] : memref<50x32xf32, #tpu.memory_space<any>> -> memref<1x32xf32, #tpu.memory_space<any>>
    %c8_i32_34 = arith.constant 8 : i32
    %c0_i32_35 = arith.constant 0 : i32
    %61 = tpu.memref_slice %arg9[%c8_i32_34, %c0_i32_35] : memref<18x32xf32, #tpu.memory_space<vmem>> -> memref<1x32xf32, #tpu.memory_space<vmem>>
    %62 = tpu.memref_slice %arg10[%c8_i32_32] : memref<18x!tpu.dma_semaphore, #tpu.memory_space<semaphore_mem>> -> memref<1x!tpu.dma_semaphore, #tpu.memory_space<semaphore_mem>>
    %63 = tpu.memref_squeeze %62 : memref<1x!tpu.dma_semaphore, #tpu.memory_space<semaphore_mem>> -> memref<!tpu.dma_semaphore, #tpu.memory_space<semaphore_mem>>
    tpu.enqueue_dma source(%60 : memref<1x32xf32, #tpu.memory_space<any>>) target(%61 : memref<1x32xf32, #tpu.memory_space<vmem>>) target_semaphore(%63 : memref<!tpu.dma_semaphore, #tpu.memory_space<semaphore_mem>>)
    %c9_i32 = arith.constant 9 : i32
    %64 = arith.addi %0, %c9_i32 : i32
    %65 = arith.index_cast %64 : i32 to index
    %66 = memref.load %arg1[%65] : memref<36xi32, #tpu.memory_space<smem>>
    %c9_i32_36 = arith.constant 9 : i32
    %c0_i32_37 = arith.constant 0 : i32
    %67 = tpu.memref_slice %arg2[%66, %c0_i32_37] : memref<50x32xf32, #tpu.memory_space<any>> -> memref<1x32xf32, #tpu.memory_space<any>>
    %c9_i32_38 = arith.constant 9 : i32
    %c0_i32_39 = arith.constant 0 : i32
    %68 = tpu.memref_slice %arg9[%c9_i32_38, %c0_i32_39] : memref<18x32xf32, #tpu.memory_space<vmem>> -> memref<1x32xf32, #tpu.memory_space<vmem>>
    %69 = tpu.memref_slice %arg10[%c9_i32_36] : memref<18x!tpu.dma_semaphore, #tpu.memory_space<semaphore_mem>> -> memref<1x!tpu.dma_semaphore, #tpu.memory_space<semaphore_mem>>
    %70 = tpu.memref_squeeze %69 : memref<1x!tpu.dma_semaphore, #tpu.memory_space<semaphore_mem>> -> memref<!tpu.dma_semaphore, #tpu.memory_space<semaphore_mem>>
    tpu.enqueue_dma source(%67 : memref<1x32xf32, #tpu.memory_space<any>>) target(%68 : memref<1x32xf32, #tpu.memory_space<vmem>>) target_semaphore(%70 : memref<!tpu.dma_semaphore, #tpu.memory_space<semaphore_mem>>)
    %c10_i32 = arith.constant 10 : i32
    %71 = arith.addi %0, %c10_i32 : i32
    %72 = arith.index_cast %71 : i32 to index
    %73 = memref.load %arg1[%72] : memref<36xi32, #tpu.memory_space<smem>>
    %c10_i32_40 = arith.constant 10 : i32
    %c0_i32_41 = arith.constant 0 : i32
    %74 = tpu.memref_slice %arg2[%73, %c0_i32_41] : memref<50x32xf32, #tpu.memory_space<any>> -> memref<1x32xf32, #tpu.memory_space<any>>
    %c10_i32_42 = arith.constant 10 : i32
    %c0_i32_43 = arith.constant 0 : i32
    %75 = tpu.memref_slice %arg9[%c10_i32_42, %c0_i32_43] : memref<18x32xf32, #tpu.memory_space<vmem>> -> memref<1x32xf32, #tpu.memory_space<vmem>>
    %76 = tpu.memref_slice %arg10[%c10_i32_40] : memref<18x!tpu.dma_semaphore, #tpu.memory_space<semaphore_mem>> -> memref<1x!tpu.dma_semaphore, #tpu.memory_space<semaphore_mem>>
    %77 = tpu.memref_squeeze %76 : memref<1x!tpu.dma_semaphore, #tpu.memory_space<semaphore_mem>> -> memref<!tpu.dma_semaphore, #tpu.memory_space<semaphore_mem>>
    tpu.enqueue_dma source(%74 : memref<1x32xf32, #tpu.memory_space<any>>) target(%75 : memref<1x32xf32, #tpu.memory_space<vmem>>) target_semaphore(%77 : memref<!tpu.dma_semaphore, #tpu.memory_space<semaphore_mem>>)
    %c11_i32 = arith.constant 11 : i32
    %78 = arith.addi %0, %c11_i32 : i32
    %79 = arith.index_cast %78 : i32 to index
    %80 = memref.load %arg1[%79] : memref<36xi32, #tpu.memory_space<smem>>
    %c11_i32_44 = arith.constant 11 : i32
    %c0_i32_45 = arith.constant 0 : i32
    %81 = tpu.memref_slice %arg2[%80, %c0_i32_45] : memref<50x32xf32, #tpu.memory_space<any>> -> memref<1x32xf32, #tpu.memory_space<any>>
    %c11_i32_46 = arith.constant 11 : i32
    %c0_i32_47 = arith.constant 0 : i32
    %82 = tpu.memref_slice %arg9[%c11_i32_46, %c0_i32_47] : memref<18x32xf32, #tpu.memory_space<vmem>> -> memref<1x32xf32, #tpu.memory_space<vmem>>
    %83 = tpu.memref_slice %arg10[%c11_i32_44] : memref<18x!tpu.dma_semaphore, #tpu.memory_space<semaphore_mem>> -> memref<1x!tpu.dma_semaphore, #tpu.memory_space<semaphore_mem>>
    %84 = tpu.memref_squeeze %83 : memref<1x!tpu.dma_semaphore, #tpu.memory_space<semaphore_mem>> -> memref<!tpu.dma_semaphore, #tpu.memory_space<semaphore_mem>>
    tpu.enqueue_dma source(%81 : memref<1x32xf32, #tpu.memory_space<any>>) target(%82 : memref<1x32xf32, #tpu.memory_space<vmem>>) target_semaphore(%84 : memref<!tpu.dma_semaphore, #tpu.memory_space<semaphore_mem>>)
    %c12_i32 = arith.constant 12 : i32
    %85 = arith.addi %0, %c12_i32 : i32
    %86 = arith.index_cast %85 : i32 to index
    %87 = memref.load %arg1[%86] : memref<36xi32, #tpu.memory_space<smem>>
    %c12_i32_48 = arith.constant 12 : i32
    %c0_i32_49 = arith.constant 0 : i32
    %88 = tpu.memref_slice %arg2[%87, %c0_i32_49] : memref<50x32xf32, #tpu.memory_space<any>> -> memref<1x32xf32, #tpu.memory_space<any>>
    %c12_i32_50 = arith.constant 12 : i32
    %c0_i32_51 = arith.constant 0 : i32
    %89 = tpu.memref_slice %arg9[%c12_i32_50, %c0_i32_51] : memref<18x32xf32, #tpu.memory_space<vmem>> -> memref<1x32xf32, #tpu.memory_space<vmem>>
    %90 = tpu.memref_slice %arg10[%c12_i32_48] : memref<18x!tpu.dma_semaphore, #tpu.memory_space<semaphore_mem>> -> memref<1x!tpu.dma_semaphore, #tpu.memory_space<semaphore_mem>>
    %91 = tpu.memref_squeeze %90 : memref<1x!tpu.dma_semaphore, #tpu.memory_space<semaphore_mem>> -> memref<!tpu.dma_semaphore, #tpu.memory_space<semaphore_mem>>
    tpu.enqueue_dma source(%88 : memref<1x32xf32, #tpu.memory_space<any>>) target(%89 : memref<1x32xf32, #tpu.memory_space<vmem>>) target_semaphore(%91 : memref<!tpu.dma_semaphore, #tpu.memory_space<semaphore_mem>>)
    %c13_i32 = arith.constant 13 : i32
    %92 = arith.addi %0, %c13_i32 : i32
    %93 = arith.index_cast %92 : i32 to index
    %94 = memref.load %arg1[%93] : memref<36xi32, #tpu.memory_space<smem>>
    %c13_i32_52 = arith.constant 13 : i32
    %c0_i32_53 = arith.constant 0 : i32
    %95 = tpu.memref_slice %arg2[%94, %c0_i32_53] : memref<50x32xf32, #tpu.memory_space<any>> -> memref<1x32xf32, #tpu.memory_space<any>>
    %c13_i32_54 = arith.constant 13 : i32
    %c0_i32_55 = arith.constant 0 : i32
    %96 = tpu.memref_slice %arg9[%c13_i32_54, %c0_i32_55] : memref<18x32xf32, #tpu.memory_space<vmem>> -> memref<1x32xf32, #tpu.memory_space<vmem>>
    %97 = tpu.memref_slice %arg10[%c13_i32_52] : memref<18x!tpu.dma_semaphore, #tpu.memory_space<semaphore_mem>> -> memref<1x!tpu.dma_semaphore, #tpu.memory_space<semaphore_mem>>
    %98 = tpu.memref_squeeze %97 : memref<1x!tpu.dma_semaphore, #tpu.memory_space<semaphore_mem>> -> memref<!tpu.dma_semaphore, #tpu.memory_space<semaphore_mem>>
    tpu.enqueue_dma source(%95 : memref<1x32xf32, #tpu.memory_space<any>>) target(%96 : memref<1x32xf32, #tpu.memory_space<vmem>>) target_semaphore(%98 : memref<!tpu.dma_semaphore, #tpu.memory_space<semaphore_mem>>)
    %c14_i32 = arith.constant 14 : i32
    %99 = arith.addi %0, %c14_i32 : i32
    %100 = arith.index_cast %99 : i32 to index
    %101 = memref.load %arg1[%100] : memref<36xi32, #tpu.memory_space<smem>>
    %c14_i32_56 = arith.constant 14 : i32
    %c0_i32_57 = arith.constant 0 : i32
    %102 = tpu.memref_slice %arg2[%101, %c0_i32_57] : memref<50x32xf32, #tpu.memory_space<any>> -> memref<1x32xf32, #tpu.memory_space<any>>
    %c14_i32_58 = arith.constant 14 : i32
    %c0_i32_59 = arith.constant 0 : i32
    %103 = tpu.memref_slice %arg9[%c14_i32_58, %c0_i32_59] : memref<18x32xf32, #tpu.memory_space<vmem>> -> memref<1x32xf32, #tpu.memory_space<vmem>>
    %104 = tpu.memref_slice %arg10[%c14_i32_56] : memref<18x!tpu.dma_semaphore, #tpu.memory_space<semaphore_mem>> -> memref<1x!tpu.dma_semaphore, #tpu.memory_space<semaphore_mem>>
    %105 = tpu.memref_squeeze %104 : memref<1x!tpu.dma_semaphore, #tpu.memory_space<semaphore_mem>> -> memref<!tpu.dma_semaphore, #tpu.memory_space<semaphore_mem>>
    tpu.enqueue_dma source(%102 : memref<1x32xf32, #tpu.memory_space<any>>) target(%103 : memref<1x32xf32, #tpu.memory_space<vmem>>) target_semaphore(%105 : memref<!tpu.dma_semaphore, #tpu.memory_space<semaphore_mem>>)
    %c15_i32 = arith.constant 15 : i32
    %106 = arith.addi %0, %c15_i32 : i32
    %107 = arith.index_cast %106 : i32 to index
    %108 = memref.load %arg1[%107] : memref<36xi32, #tpu.memory_space<smem>>
    %c15_i32_60 = arith.constant 15 : i32
    %c0_i32_61 = arith.constant 0 : i32
    %109 = tpu.memref_slice %arg2[%108, %c0_i32_61] : memref<50x32xf32, #tpu.memory_space<any>> -> memref<1x32xf32, #tpu.memory_space<any>>
    %c15_i32_62 = arith.constant 15 : i32
    %c0_i32_63 = arith.constant 0 : i32
    %110 = tpu.memref_slice %arg9[%c15_i32_62, %c0_i32_63] : memref<18x32xf32, #tpu.memory_space<vmem>> -> memref<1x32xf32, #tpu.memory_space<vmem>>
    %111 = tpu.memref_slice %arg10[%c15_i32_60] : memref<18x!tpu.dma_semaphore, #tpu.memory_space<semaphore_mem>> -> memref<1x!tpu.dma_semaphore, #tpu.memory_space<semaphore_mem>>
    %112 = tpu.memref_squeeze %111 : memref<1x!tpu.dma_semaphore, #tpu.memory_space<semaphore_mem>> -> memref<!tpu.dma_semaphore, #tpu.memory_space<semaphore_mem>>
    tpu.enqueue_dma source(%109 : memref<1x32xf32, #tpu.memory_space<any>>) target(%110 : memref<1x32xf32, #tpu.memory_space<vmem>>) target_semaphore(%112 : memref<!tpu.dma_semaphore, #tpu.memory_space<semaphore_mem>>)
    %c16_i32 = arith.constant 16 : i32
    %113 = arith.addi %0, %c16_i32 : i32
    %114 = arith.index_cast %113 : i32 to index
    %115 = memref.load %arg1[%114] : memref<36xi32, #tpu.memory_space<smem>>
    %c16_i32_64 = arith.constant 16 : i32
    %c0_i32_65 = arith.constant 0 : i32
    %116 = tpu.memref_slice %arg2[%115, %c0_i32_65] : memref<50x32xf32, #tpu.memory_space<any>> -> memref<1x32xf32, #tpu.memory_space<any>>
    %c16_i32_66 = arith.constant 16 : i32
    %c0_i32_67 = arith.constant 0 : i32
    %117 = tpu.memref_slice %arg9[%c16_i32_66, %c0_i32_67] : memref<18x32xf32, #tpu.memory_space<vmem>> -> memref<1x32xf32, #tpu.memory_space<vmem>>
    %118 = tpu.memref_slice %arg10[%c16_i32_64] : memref<18x!tpu.dma_semaphore, #tpu.memory_space<semaphore_mem>> -> memref<1x!tpu.dma_semaphore, #tpu.memory_space<semaphore_mem>>
    %119 = tpu.memref_squeeze %118 : memref<1x!tpu.dma_semaphore, #tpu.memory_space<semaphore_mem>> -> memref<!tpu.dma_semaphore, #tpu.memory_space<semaphore_mem>>
    tpu.enqueue_dma source(%116 : memref<1x32xf32, #tpu.memory_space<any>>) target(%117 : memref<1x32xf32, #tpu.memory_space<vmem>>) target_semaphore(%119 : memref<!tpu.dma_semaphore, #tpu.memory_space<semaphore_mem>>)
    %c17_i32 = arith.constant 17 : i32
    %120 = arith.addi %0, %c17_i32 : i32
    %121 = arith.index_cast %120 : i32 to index
    %122 = memref.load %arg1[%121] : memref<36xi32, #tpu.memory_space<smem>>
    %c17_i32_68 = arith.constant 17 : i32
    %c0_i32_69 = arith.constant 0 : i32
    %123 = tpu.memref_slice %arg2[%122, %c0_i32_69] : memref<50x32xf32, #tpu.memory_space<any>> -> memref<1x32xf32, #tpu.memory_space<any>>
    %c17_i32_70 = arith.constant 17 : i32
    %c0_i32_71 = arith.constant 0 : i32
    %124 = tpu.memref_slice %arg9[%c17_i32_70, %c0_i32_71] : memref<18x32xf32, #tpu.memory_space<vmem>> -> memref<1x32xf32, #tpu.memory_space<vmem>>
    %125 = tpu.memref_slice %arg10[%c17_i32_68] : memref<18x!tpu.dma_semaphore, #tpu.memory_space<semaphore_mem>> -> memref<1x!tpu.dma_semaphore, #tpu.memory_space<semaphore_mem>>
    %126 = tpu.memref_squeeze %125 : memref<1x!tpu.dma_semaphore, #tpu.memory_space<semaphore_mem>> -> memref<!tpu.dma_semaphore, #tpu.memory_space<semaphore_mem>>
    tpu.enqueue_dma source(%123 : memref<1x32xf32, #tpu.memory_space<any>>) target(%124 : memref<1x32xf32, #tpu.memory_space<vmem>>) target_semaphore(%126 : memref<!tpu.dma_semaphore, #tpu.memory_space<semaphore_mem>>)
    %c0_i32_72 = arith.constant 0 : i32
    %c0_i32_73 = arith.constant 0 : i32
    %c0_i32_74 = arith.constant 0 : i32
    %127 = tpu.memref_slice %arg2[%c0_i32_73, %c0_i32_74] : memref<50x32xf32, #tpu.memory_space<any>> -> memref<1x32xf32, #tpu.memory_space<any>>
    %c0_i32_75 = arith.constant 0 : i32
    %c0_i32_76 = arith.constant 0 : i32
    %128 = tpu.memref_slice %arg9[%c0_i32_75, %c0_i32_76] : memref<18x32xf32, #tpu.memory_space<vmem>> -> memref<1x32xf32, #tpu.memory_space<vmem>>
    %129 = tpu.memref_slice %arg10[%c0_i32_72] : memref<18x!tpu.dma_semaphore, #tpu.memory_space<semaphore_mem>> -> memref<1x!tpu.dma_semaphore, #tpu.memory_space<semaphore_mem>>
    %130 = tpu.memref_squeeze %129 : memref<1x!tpu.dma_semaphore, #tpu.memory_space<semaphore_mem>> -> memref<!tpu.dma_semaphore, #tpu.memory_space<semaphore_mem>>
    tpu.wait_dma2 semaphore(%130 : memref<!tpu.dma_semaphore, #tpu.memory_space<semaphore_mem>>) src(%127 : memref<1x32xf32, #tpu.memory_space<any>>) dst(%128 : memref<1x32xf32, #tpu.memory_space<vmem>>)
    %c1_i32_77 = arith.constant 1 : i32
    %c0_i32_78 = arith.constant 0 : i32
    %c0_i32_79 = arith.constant 0 : i32
    %131 = tpu.memref_slice %arg2[%c0_i32_78, %c0_i32_79] : memref<50x32xf32, #tpu.memory_space<any>> -> memref<1x32xf32, #tpu.memory_space<any>>
    %c1_i32_80 = arith.constant 1 : i32
    %c0_i32_81 = arith.constant 0 : i32
    %132 = tpu.memref_slice %arg9[%c1_i32_80, %c0_i32_81] : memref<18x32xf32, #tpu.memory_space<vmem>> -> memref<1x32xf32, #tpu.memory_space<vmem>>
    %133 = tpu.memref_slice %arg10[%c1_i32_77] : memref<18x!tpu.dma_semaphore, #tpu.memory_space<semaphore_mem>> -> memref<1x!tpu.dma_semaphore, #tpu.memory_space<semaphore_mem>>
    %134 = tpu.memref_squeeze %133 : memref<1x!tpu.dma_semaphore, #tpu.memory_space<semaphore_mem>> -> memref<!tpu.dma_semaphore, #tpu.memory_space<semaphore_mem>>
    tpu.wait_dma2 semaphore(%134 : memref<!tpu.dma_semaphore, #tpu.memory_space<semaphore_mem>>) src(%131 : memref<1x32xf32, #tpu.memory_space<any>>) dst(%132 : memref<1x32xf32, #tpu.memory_space<vmem>>)
    %c2_i32_82 = arith.constant 2 : i32
    %c0_i32_83 = arith.constant 0 : i32
    %c0_i32_84 = arith.constant 0 : i32
    %135 = tpu.memref_slice %arg2[%c0_i32_83, %c0_i32_84] : memref<50x32xf32, #tpu.memory_space<any>> -> memref<1x32xf32, #tpu.memory_space<any>>
    %c2_i32_85 = arith.constant 2 : i32
    %c0_i32_86 = arith.constant 0 : i32
    %136 = tpu.memref_slice %arg9[%c2_i32_85, %c0_i32_86] : memref<18x32xf32, #tpu.memory_space<vmem>> -> memref<1x32xf32, #tpu.memory_space<vmem>>
    %137 = tpu.memref_slice %arg10[%c2_i32_82] : memref<18x!tpu.dma_semaphore, #tpu.memory_space<semaphore_mem>> -> memref<1x!tpu.dma_semaphore, #tpu.memory_space<semaphore_mem>>
    %138 = tpu.memref_squeeze %137 : memref<1x!tpu.dma_semaphore, #tpu.memory_space<semaphore_mem>> -> memref<!tpu.dma_semaphore, #tpu.memory_space<semaphore_mem>>
    tpu.wait_dma2 semaphore(%138 : memref<!tpu.dma_semaphore, #tpu.memory_space<semaphore_mem>>) src(%135 : memref<1x32xf32, #tpu.memory_space<any>>) dst(%136 : memref<1x32xf32, #tpu.memory_space<vmem>>)
    %c3_i32_87 = arith.constant 3 : i32
    %c0_i32_88 = arith.constant 0 : i32
    %c0_i32_89 = arith.constant 0 : i32
    %139 = tpu.memref_slice %arg2[%c0_i32_88, %c0_i32_89] : memref<50x32xf32, #tpu.memory_space<any>> -> memref<1x32xf32, #tpu.memory_space<any>>
    %c3_i32_90 = arith.constant 3 : i32
    %c0_i32_91 = arith.constant 0 : i32
    %140 = tpu.memref_slice %arg9[%c3_i32_90, %c0_i32_91] : memref<18x32xf32, #tpu.memory_space<vmem>> -> memref<1x32xf32, #tpu.memory_space<vmem>>
    %141 = tpu.memref_slice %arg10[%c3_i32_87] : memref<18x!tpu.dma_semaphore, #tpu.memory_space<semaphore_mem>> -> memref<1x!tpu.dma_semaphore, #tpu.memory_space<semaphore_mem>>
    %142 = tpu.memref_squeeze %141 : memref<1x!tpu.dma_semaphore, #tpu.memory_space<semaphore_mem>> -> memref<!tpu.dma_semaphore, #tpu.memory_space<semaphore_mem>>
    tpu.wait_dma2 semaphore(%142 : memref<!tpu.dma_semaphore, #tpu.memory_space<semaphore_mem>>) src(%139 : memref<1x32xf32, #tpu.memory_space<any>>) dst(%140 : memref<1x32xf32, #tpu.memory_space<vmem>>)
    %c4_i32_92 = arith.constant 4 : i32
    %c0_i32_93 = arith.constant 0 : i32
    %c0_i32_94 = arith.constant 0 : i32
    %143 = tpu.memref_slice %arg2[%c0_i32_93, %c0_i32_94] : memref<50x32xf32, #tpu.memory_space<any>> -> memref<1x32xf32, #tpu.memory_space<any>>
    %c4_i32_95 = arith.constant 4 : i32
    %c0_i32_96 = arith.constant 0 : i32
    %144 = tpu.memref_slice %arg9[%c4_i32_95, %c0_i32_96] : memref<18x32xf32, #tpu.memory_space<vmem>> -> memref<1x32xf32, #tpu.memory_space<vmem>>
    %145 = tpu.memref_slice %arg10[%c4_i32_92] : memref<18x!tpu.dma_semaphore, #tpu.memory_space<semaphore_mem>> -> memref<1x!tpu.dma_semaphore, #tpu.memory_space<semaphore_mem>>
    %146 = tpu.memref_squeeze %145 : memref<1x!tpu.dma_semaphore, #tpu.memory_space<semaphore_mem>> -> memref<!tpu.dma_semaphore, #tpu.memory_space<semaphore_mem>>
    tpu.wait_dma2 semaphore(%146 : memref<!tpu.dma_semaphore, #tpu.memory_space<semaphore_mem>>) src(%143 : memref<1x32xf32, #tpu.memory_space<any>>) dst(%144 : memref<1x32xf32, #tpu.memory_space<vmem>>)
    %c5_i32_97 = arith.constant 5 : i32
    %c0_i32_98 = arith.constant 0 : i32
    %c0_i32_99 = arith.constant 0 : i32
    %147 = tpu.memref_slice %arg2[%c0_i32_98, %c0_i32_99] : memref<50x32xf32, #tpu.memory_space<any>> -> memref<1x32xf32, #tpu.memory_space<any>>
    %c5_i32_100 = arith.constant 5 : i32
    %c0_i32_101 = arith.constant 0 : i32
    %148 = tpu.memref_slice %arg9[%c5_i32_100, %c0_i32_101] : memref<18x32xf32, #tpu.memory_space<vmem>> -> memref<1x32xf32, #tpu.memory_space<vmem>>
    %149 = tpu.memref_slice %arg10[%c5_i32_97] : memref<18x!tpu.dma_semaphore, #tpu.memory_space<semaphore_mem>> -> memref<1x!tpu.dma_semaphore, #tpu.memory_space<semaphore_mem>>
    %150 = tpu.memref_squeeze %149 : memref<1x!tpu.dma_semaphore, #tpu.memory_space<semaphore_mem>> -> memref<!tpu.dma_semaphore, #tpu.memory_space<semaphore_mem>>
    tpu.wait_dma2 semaphore(%150 : memref<!tpu.dma_semaphore, #tpu.memory_space<semaphore_mem>>) src(%147 : memref<1x32xf32, #tpu.memory_space<any>>) dst(%148 : memref<1x32xf32, #tpu.memory_space<vmem>>)
    %c6_i32_102 = arith.constant 6 : i32
    %c0_i32_103 = arith.constant 0 : i32
    %c0_i32_104 = arith.constant 0 : i32
    %151 = tpu.memref_slice %arg2[%c0_i32_103, %c0_i32_104] : memref<50x32xf32, #tpu.memory_space<any>> -> memref<1x32xf32, #tpu.memory_space<any>>
    %c6_i32_105 = arith.constant 6 : i32
    %c0_i32_106 = arith.constant 0 : i32
    %152 = tpu.memref_slice %arg9[%c6_i32_105, %c0_i32_106] : memref<18x32xf32, #tpu.memory_space<vmem>> -> memref<1x32xf32, #tpu.memory_space<vmem>>
    %153 = tpu.memref_slice %arg10[%c6_i32_102] : memref<18x!tpu.dma_semaphore, #tpu.memory_space<semaphore_mem>> -> memref<1x!tpu.dma_semaphore, #tpu.memory_space<semaphore_mem>>
    %154 = tpu.memref_squeeze %153 : memref<1x!tpu.dma_semaphore, #tpu.memory_space<semaphore_mem>> -> memref<!tpu.dma_semaphore, #tpu.memory_space<semaphore_mem>>
    tpu.wait_dma2 semaphore(%154 : memref<!tpu.dma_semaphore, #tpu.memory_space<semaphore_mem>>) src(%151 : memref<1x32xf32, #tpu.memory_space<any>>) dst(%152 : memref<1x32xf32, #tpu.memory_space<vmem>>)
    %c7_i32_107 = arith.constant 7 : i32
    %c0_i32_108 = arith.constant 0 : i32
    %c0_i32_109 = arith.constant 0 : i32
    %155 = tpu.memref_slice %arg2[%c0_i32_108, %c0_i32_109] : memref<50x32xf32, #tpu.memory_space<any>> -> memref<1x32xf32, #tpu.memory_space<any>>
    %c7_i32_110 = arith.constant 7 : i32
    %c0_i32_111 = arith.constant 0 : i32
    %156 = tpu.memref_slice %arg9[%c7_i32_110, %c0_i32_111] : memref<18x32xf32, #tpu.memory_space<vmem>> -> memref<1x32xf32, #tpu.memory_space<vmem>>
    %157 = tpu.memref_slice %arg10[%c7_i32_107] : memref<18x!tpu.dma_semaphore, #tpu.memory_space<semaphore_mem>> -> memref<1x!tpu.dma_semaphore, #tpu.memory_space<semaphore_mem>>
    %158 = tpu.memref_squeeze %157 : memref<1x!tpu.dma_semaphore, #tpu.memory_space<semaphore_mem>> -> memref<!tpu.dma_semaphore, #tpu.memory_space<semaphore_mem>>
    tpu.wait_dma2 semaphore(%158 : memref<!tpu.dma_semaphore, #tpu.memory_space<semaphore_mem>>) src(%155 : memref<1x32xf32, #tpu.memory_space<any>>) dst(%156 : memref<1x32xf32, #tpu.memory_space<vmem>>)
    %c8_i32_112 = arith.constant 8 : i32
    %c0_i32_113 = arith.constant 0 : i32
    %c0_i32_114 = arith.constant 0 : i32
    %159 = tpu.memref_slice %arg2[%c0_i32_113, %c0_i32_114] : memref<50x32xf32, #tpu.memory_space<any>> -> memref<1x32xf32, #tpu.memory_space<any>>
    %c8_i32_115 = arith.constant 8 : i32
    %c0_i32_116 = arith.constant 0 : i32
    %160 = tpu.memref_slice %arg9[%c8_i32_115, %c0_i32_116] : memref<18x32xf32, #tpu.memory_space<vmem>> -> memref<1x32xf32, #tpu.memory_space<vmem>>
    %161 = tpu.memref_slice %arg10[%c8_i32_112] : memref<18x!tpu.dma_semaphore, #tpu.memory_space<semaphore_mem>> -> memref<1x!tpu.dma_semaphore, #tpu.memory_space<semaphore_mem>>
    %162 = tpu.memref_squeeze %161 : memref<1x!tpu.dma_semaphore, #tpu.memory_space<semaphore_mem>> -> memref<!tpu.dma_semaphore, #tpu.memory_space<semaphore_mem>>
    tpu.wait_dma2 semaphore(%162 : memref<!tpu.dma_semaphore, #tpu.memory_space<semaphore_mem>>) src(%159 : memref<1x32xf32, #tpu.memory_space<any>>) dst(%160 : memref<1x32xf32, #tpu.memory_space<vmem>>)
    %c9_i32_117 = arith.constant 9 : i32
    %c0_i32_118 = arith.constant 0 : i32
    %c0_i32_119 = arith.constant 0 : i32
    %163 = tpu.memref_slice %arg2[%c0_i32_118, %c0_i32_119] : memref<50x32xf32, #tpu.memory_space<any>> -> memref<1x32xf32, #tpu.memory_space<any>>
    %c9_i32_120 = arith.constant 9 : i32
    %c0_i32_121 = arith.constant 0 : i32
    %164 = tpu.memref_slice %arg9[%c9_i32_120, %c0_i32_121] : memref<18x32xf32, #tpu.memory_space<vmem>> -> memref<1x32xf32, #tpu.memory_space<vmem>>
    %165 = tpu.memref_slice %arg10[%c9_i32_117] : memref<18x!tpu.dma_semaphore, #tpu.memory_space<semaphore_mem>> -> memref<1x!tpu.dma_semaphore, #tpu.memory_space<semaphore_mem>>
    %166 = tpu.memref_squeeze %165 : memref<1x!tpu.dma_semaphore, #tpu.memory_space<semaphore_mem>> -> memref<!tpu.dma_semaphore, #tpu.memory_space<semaphore_mem>>
    tpu.wait_dma2 semaphore(%166 : memref<!tpu.dma_semaphore, #tpu.memory_space<semaphore_mem>>) src(%163 : memref<1x32xf32, #tpu.memory_space<any>>) dst(%164 : memref<1x32xf32, #tpu.memory_space<vmem>>)
    %c10_i32_122 = arith.constant 10 : i32
    %c0_i32_123 = arith.constant 0 : i32
    %c0_i32_124 = arith.constant 0 : i32
    %167 = tpu.memref_slice %arg2[%c0_i32_123, %c0_i32_124] : memref<50x32xf32, #tpu.memory_space<any>> -> memref<1x32xf32, #tpu.memory_space<any>>
    %c10_i32_125 = arith.constant 10 : i32
    %c0_i32_126 = arith.constant 0 : i32
    %168 = tpu.memref_slice %arg9[%c10_i32_125, %c0_i32_126] : memref<18x32xf32, #tpu.memory_space<vmem>> -> memref<1x32xf32, #tpu.memory_space<vmem>>
    %169 = tpu.memref_slice %arg10[%c10_i32_122] : memref<18x!tpu.dma_semaphore, #tpu.memory_space<semaphore_mem>> -> memref<1x!tpu.dma_semaphore, #tpu.memory_space<semaphore_mem>>
    %170 = tpu.memref_squeeze %169 : memref<1x!tpu.dma_semaphore, #tpu.memory_space<semaphore_mem>> -> memref<!tpu.dma_semaphore, #tpu.memory_space<semaphore_mem>>
    tpu.wait_dma2 semaphore(%170 : memref<!tpu.dma_semaphore, #tpu.memory_space<semaphore_mem>>) src(%167 : memref<1x32xf32, #tpu.memory_space<any>>) dst(%168 : memref<1x32xf32, #tpu.memory_space<vmem>>)
    %c11_i32_127 = arith.constant 11 : i32
    %c0_i32_128 = arith.constant 0 : i32
    %c0_i32_129 = arith.constant 0 : i32
    %171 = tpu.memref_slice %arg2[%c0_i32_128, %c0_i32_129] : memref<50x32xf32, #tpu.memory_space<any>> -> memref<1x32xf32, #tpu.memory_space<any>>
    %c11_i32_130 = arith.constant 11 : i32
    %c0_i32_131 = arith.constant 0 : i32
    %172 = tpu.memref_slice %arg9[%c11_i32_130, %c0_i32_131] : memref<18x32xf32, #tpu.memory_space<vmem>> -> memref<1x32xf32, #tpu.memory_space<vmem>>
    %173 = tpu.memref_slice %arg10[%c11_i32_127] : memref<18x!tpu.dma_semaphore, #tpu.memory_space<semaphore_mem>> -> memref<1x!tpu.dma_semaphore, #tpu.memory_space<semaphore_mem>>
    %174 = tpu.memref_squeeze %173 : memref<1x!tpu.dma_semaphore, #tpu.memory_space<semaphore_mem>> -> memref<!tpu.dma_semaphore, #tpu.memory_space<semaphore_mem>>
    tpu.wait_dma2 semaphore(%174 : memref<!tpu.dma_semaphore, #tpu.memory_space<semaphore_mem>>) src(%171 : memref<1x32xf32, #tpu.memory_space<any>>) dst(%172 : memref<1x32xf32, #tpu.memory_space<vmem>>)
    %c12_i32_132 = arith.constant 12 : i32
    %c0_i32_133 = arith.constant 0 : i32
    %c0_i32_134 = arith.constant 0 : i32
    %175 = tpu.memref_slice %arg2[%c0_i32_133, %c0_i32_134] : memref<50x32xf32, #tpu.memory_space<any>> -> memref<1x32xf32, #tpu.memory_space<any>>
    %c12_i32_135 = arith.constant 12 : i32
    %c0_i32_136 = arith.constant 0 : i32
    %176 = tpu.memref_slice %arg9[%c12_i32_135, %c0_i32_136] : memref<18x32xf32, #tpu.memory_space<vmem>> -> memref<1x32xf32, #tpu.memory_space<vmem>>
    %177 = tpu.memref_slice %arg10[%c12_i32_132] : memref<18x!tpu.dma_semaphore, #tpu.memory_space<semaphore_mem>> -> memref<1x!tpu.dma_semaphore, #tpu.memory_space<semaphore_mem>>
    %178 = tpu.memref_squeeze %177 : memref<1x!tpu.dma_semaphore, #tpu.memory_space<semaphore_mem>> -> memref<!tpu.dma_semaphore, #tpu.memory_space<semaphore_mem>>
    tpu.wait_dma2 semaphore(%178 : memref<!tpu.dma_semaphore, #tpu.memory_space<semaphore_mem>>) src(%175 : memref<1x32xf32, #tpu.memory_space<any>>) dst(%176 : memref<1x32xf32, #tpu.memory_space<vmem>>)
    %c13_i32_137 = arith.constant 13 : i32
    %c0_i32_138 = arith.constant 0 : i32
    %c0_i32_139 = arith.constant 0 : i32
    %179 = tpu.memref_slice %arg2[%c0_i32_138, %c0_i32_139] : memref<50x32xf32, #tpu.memory_space<any>> -> memref<1x32xf32, #tpu.memory_space<any>>
    %c13_i32_140 = arith.constant 13 : i32
    %c0_i32_141 = arith.constant 0 : i32
    %180 = tpu.memref_slice %arg9[%c13_i32_140, %c0_i32_141] : memref<18x32xf32, #tpu.memory_space<vmem>> -> memref<1x32xf32, #tpu.memory_space<vmem>>
    %181 = tpu.memref_slice %arg10[%c13_i32_137] : memref<18x!tpu.dma_semaphore, #tpu.memory_space<semaphore_mem>> -> memref<1x!tpu.dma_semaphore, #tpu.memory_space<semaphore_mem>>
    %182 = tpu.memref_squeeze %181 : memref<1x!tpu.dma_semaphore, #tpu.memory_space<semaphore_mem>> -> memref<!tpu.dma_semaphore, #tpu.memory_space<semaphore_mem>>
    tpu.wait_dma2 semaphore(%182 : memref<!tpu.dma_semaphore, #tpu.memory_space<semaphore_mem>>) src(%179 : memref<1x32xf32, #tpu.memory_space<any>>) dst(%180 : memref<1x32xf32, #tpu.memory_space<vmem>>)
    %c14_i32_142 = arith.constant 14 : i32
    %c0_i32_143 = arith.constant 0 : i32
    %c0_i32_144 = arith.constant 0 : i32
    %183 = tpu.memref_slice %arg2[%c0_i32_143, %c0_i32_144] : memref<50x32xf32, #tpu.memory_space<any>> -> memref<1x32xf32, #tpu.memory_space<any>>
    %c14_i32_145 = arith.constant 14 : i32
    %c0_i32_146 = arith.constant 0 : i32
    %184 = tpu.memref_slice %arg9[%c14_i32_145, %c0_i32_146] : memref<18x32xf32, #tpu.memory_space<vmem>> -> memref<1x32xf32, #tpu.memory_space<vmem>>
    %185 = tpu.memref_slice %arg10[%c14_i32_142] : memref<18x!tpu.dma_semaphore, #tpu.memory_space<semaphore_mem>> -> memref<1x!tpu.dma_semaphore, #tpu.memory_space<semaphore_mem>>
    %186 = tpu.memref_squeeze %185 : memref<1x!tpu.dma_semaphore, #tpu.memory_space<semaphore_mem>> -> memref<!tpu.dma_semaphore, #tpu.memory_space<semaphore_mem>>
    tpu.wait_dma2 semaphore(%186 : memref<!tpu.dma_semaphore, #tpu.memory_space<semaphore_mem>>) src(%183 : memref<1x32xf32, #tpu.memory_space<any>>) dst(%184 : memref<1x32xf32, #tpu.memory_space<vmem>>)
    %c15_i32_147 = arith.constant 15 : i32
    %c0_i32_148 = arith.constant 0 : i32
    %c0_i32_149 = arith.constant 0 : i32
    %187 = tpu.memref_slice %arg2[%c0_i32_148, %c0_i32_149] : memref<50x32xf32, #tpu.memory_space<any>> -> memref<1x32xf32, #tpu.memory_space<any>>
    %c15_i32_150 = arith.constant 15 : i32
    %c0_i32_151 = arith.constant 0 : i32
    %188 = tpu.memref_slice %arg9[%c15_i32_150, %c0_i32_151] : memref<18x32xf32, #tpu.memory_space<vmem>> -> memref<1x32xf32, #tpu.memory_space<vmem>>
    %189 = tpu.memref_slice %arg10[%c15_i32_147] : memref<18x!tpu.dma_semaphore, #tpu.memory_space<semaphore_mem>> -> memref<1x!tpu.dma_semaphore, #tpu.memory_space<semaphore_mem>>
    %190 = tpu.memref_squeeze %189 : memref<1x!tpu.dma_semaphore, #tpu.memory_space<semaphore_mem>> -> memref<!tpu.dma_semaphore, #tpu.memory_space<semaphore_mem>>
    tpu.wait_dma2 semaphore(%190 : memref<!tpu.dma_semaphore, #tpu.memory_space<semaphore_mem>>) src(%187 : memref<1x32xf32, #tpu.memory_space<any>>) dst(%188 : memref<1x32xf32, #tpu.memory_space<vmem>>)
    %c16_i32_152 = arith.constant 16 : i32
    %c0_i32_153 = arith.constant 0 : i32
    %c0_i32_154 = arith.constant 0 : i32
    %191 = tpu.memref_slice %arg2[%c0_i32_153, %c0_i32_154] : memref<50x32xf32, #tpu.memory_space<any>> -> memref<1x32xf32, #tpu.memory_space<any>>
    %c16_i32_155 = arith.constant 16 : i32
    %c0_i32_156 = arith.constant 0 : i32
    %192 = tpu.memref_slice %arg9[%c16_i32_155, %c0_i32_156] : memref<18x32xf32, #tpu.memory_space<vmem>> -> memref<1x32xf32, #tpu.memory_space<vmem>>
    %193 = tpu.memref_slice %arg10[%c16_i32_152] : memref<18x!tpu.dma_semaphore, #tpu.memory_space<semaphore_mem>> -> memref<1x!tpu.dma_semaphore, #tpu.memory_space<semaphore_mem>>
    %194 = tpu.memref_squeeze %193 : memref<1x!tpu.dma_semaphore, #tpu.memory_space<semaphore_mem>> -> memref<!tpu.dma_semaphore, #tpu.memory_space<semaphore_mem>>
    tpu.wait_dma2 semaphore(%194 : memref<!tpu.dma_semaphore, #tpu.memory_space<semaphore_mem>>) src(%191 : memref<1x32xf32, #tpu.memory_space<any>>) dst(%192 : memref<1x32xf32, #tpu.memory_space<vmem>>)
    %c17_i32_157 = arith.constant 17 : i32
    %c0_i32_158 = arith.constant 0 : i32
    %c0_i32_159 = arith.constant 0 : i32
    %195 = tpu.memref_slice %arg2[%c0_i32_158, %c0_i32_159] : memref<50x32xf32, #tpu.memory_space<any>> -> memref<1x32xf32, #tpu.memory_space<any>>
    %c17_i32_160 = arith.constant 17 : i32
    %c0_i32_161 = arith.constant 0 : i32
    %196 = tpu.memref_slice %arg9[%c17_i32_160, %c0_i32_161] : memref<18x32xf32, #tpu.memory_space<vmem>> -> memref<1x32xf32, #tpu.memory_space<vmem>>
    %197 = tpu.memref_slice %arg10[%c17_i32_157] : memref<18x!tpu.dma_semaphore, #tpu.memory_space<semaphore_mem>> -> memref<1x!tpu.dma_semaphore, #tpu.memory_space<semaphore_mem>>
    %198 = tpu.memref_squeeze %197 : memref<1x!tpu.dma_semaphore, #tpu.memory_space<semaphore_mem>> -> memref<!tpu.dma_semaphore, #tpu.memory_space<semaphore_mem>>
    tpu.wait_dma2 semaphore(%198 : memref<!tpu.dma_semaphore, #tpu.memory_space<semaphore_mem>>) src(%195 : memref<1x32xf32, #tpu.memory_space<any>>) dst(%196 : memref<1x32xf32, #tpu.memory_space<vmem>>)
    %cst = arith.constant 0.000000e+00 : f32
    %199 = vector.broadcast %cst : f32 to vector<14x128xf32>
    %c0 = arith.constant 0 : index
    %c0_162 = arith.constant 0 : index
    %200 = vector.load %arg9[%c0, %c0_162] : memref<18x32xf32, #tpu.memory_space<vmem>>, vector<14x32xf32>
    %201 = arith.truncf %200 : vector<14x32xf32> to vector<14x32xbf16>
    %c0_163 = arith.constant 0 : index
    %c0_164 = arith.constant 0 : index
    %c0_165 = arith.constant 0 : index
    %202 = vector.load %arg3[%c0_163, %c0_164, %c0_165] : memref<5x32x128xbf16, #tpu.memory_space<vmem>>, vector<1x32x128xbf16>
    %203 = vector.shape_cast %202 : vector<1x32x128xbf16> to vector<32x128xbf16>
    %cst_166 = arith.constant dense<0.000000e+00> : vector<14x128xf32>
    %204 = tpu.matmul %201, %203, %cst_166 {dimension_numbers = #tpu.dot_dimension_numbers<[1], [0], [0], [1], [0, 0, 1, 1], [], []>} : vector<14x32xbf16>, vector<32x128xbf16>, vector<14x128xf32> -> vector<14x128xf32>
    %205 = arith.addf %199, %204 : vector<14x128xf32>
    %c1 = arith.constant 1 : index
    %c0_167 = arith.constant 0 : index
    %206 = vector.load %arg9[%c1, %c0_167] : memref<18x32xf32, #tpu.memory_space<vmem>>, vector<14x32xf32>
    %207 = arith.truncf %206 : vector<14x32xf32> to vector<14x32xbf16>
    %c1_168 = arith.constant 1 : index
    %c0_169 = arith.constant 0 : index
    %c0_170 = arith.constant 0 : index
    %208 = vector.load %arg3[%c1_168, %c0_169, %c0_170] : memref<5x32x128xbf16, #tpu.memory_space<vmem>>, vector<1x32x128xbf16>
    %209 = vector.shape_cast %208 : vector<1x32x128xbf16> to vector<32x128xbf16>
    %cst_171 = arith.constant dense<0.000000e+00> : vector<14x128xf32>
    %210 = tpu.matmul %207, %209, %cst_171 {dimension_numbers = #tpu.dot_dimension_numbers<[1], [0], [0], [1], [0, 0, 1, 1], [], []>} : vector<14x32xbf16>, vector<32x128xbf16>, vector<14x128xf32> -> vector<14x128xf32>
    %211 = arith.addf %205, %210 : vector<14x128xf32>
    %c2 = arith.constant 2 : index
    %c0_172 = arith.constant 0 : index
    %212 = vector.load %arg9[%c2, %c0_172] : memref<18x32xf32, #tpu.memory_space<vmem>>, vector<14x32xf32>
    %213 = arith.truncf %212 : vector<14x32xf32> to vector<14x32xbf16>
    %c2_173 = arith.constant 2 : index
    %c0_174 = arith.constant 0 : index
    %c0_175 = arith.constant 0 : index
    %214 = vector.load %arg3[%c2_173, %c0_174, %c0_175] : memref<5x32x128xbf16, #tpu.memory_space<vmem>>, vector<1x32x128xbf16>
    %215 = vector.shape_cast %214 : vector<1x32x128xbf16> to vector<32x128xbf16>
    %cst_176 = arith.constant dense<0.000000e+00> : vector<14x128xf32>
    %216 = tpu.matmul %213, %215, %cst_176 {dimension_numbers = #tpu.dot_dimension_numbers<[1], [0], [0], [1], [0, 0, 1, 1], [], []>} : vector<14x32xbf16>, vector<32x128xbf16>, vector<14x128xf32> -> vector<14x128xf32>
    %217 = arith.addf %211, %216 : vector<14x128xf32>
    %c3 = arith.constant 3 : index
    %c0_177 = arith.constant 0 : index
    %218 = vector.load %arg9[%c3, %c0_177] : memref<18x32xf32, #tpu.memory_space<vmem>>, vector<14x32xf32>
    %219 = arith.truncf %218 : vector<14x32xf32> to vector<14x32xbf16>
    %c3_178 = arith.constant 3 : index
    %c0_179 = arith.constant 0 : index
    %c0_180 = arith.constant 0 : index
    %220 = vector.load %arg3[%c3_178, %c0_179, %c0_180] : memref<5x32x128xbf16, #tpu.memory_space<vmem>>, vector<1x32x128xbf16>
    %221 = vector.shape_cast %220 : vector<1x32x128xbf16> to vector<32x128xbf16>
    %cst_181 = arith.constant dense<0.000000e+00> : vector<14x128xf32>
    %222 = tpu.matmul %219, %221, %cst_181 {dimension_numbers = #tpu.dot_dimension_numbers<[1], [0], [0], [1], [0, 0, 1, 1], [], []>} : vector<14x32xbf16>, vector<32x128xbf16>, vector<14x128xf32> -> vector<14x128xf32>
    %223 = arith.addf %217, %222 : vector<14x128xf32>
    %c4 = arith.constant 4 : index
    %c0_182 = arith.constant 0 : index
    %224 = vector.load %arg9[%c4, %c0_182] : memref<18x32xf32, #tpu.memory_space<vmem>>, vector<14x32xf32>
    %225 = arith.truncf %224 : vector<14x32xf32> to vector<14x32xbf16>
    %c4_183 = arith.constant 4 : index
    %c0_184 = arith.constant 0 : index
    %c0_185 = arith.constant 0 : index
    %226 = vector.load %arg3[%c4_183, %c0_184, %c0_185] : memref<5x32x128xbf16, #tpu.memory_space<vmem>>, vector<1x32x128xbf16>
    %227 = vector.shape_cast %226 : vector<1x32x128xbf16> to vector<32x128xbf16>
    %cst_186 = arith.constant dense<0.000000e+00> : vector<14x128xf32>
    %228 = tpu.matmul %225, %227, %cst_186 {dimension_numbers = #tpu.dot_dimension_numbers<[1], [0], [0], [1], [0, 0, 1, 1], [], []>} : vector<14x32xbf16>, vector<32x128xbf16>, vector<14x128xf32> -> vector<14x128xf32>
    %229 = arith.addf %223, %228 : vector<14x128xf32>
    %c0_187 = arith.constant 0 : index
    %c0_188 = arith.constant 0 : index
    %230 = vector.load %arg4[%c0_187, %c0_188] : memref<1x128xf32, #tpu.memory_space<vmem>>, vector<1x128xf32>
    %231 = vector.broadcast %230 : vector<1x128xf32> to vector<14x128xf32>
    %232 = arith.addf %229, %231 : vector<14x128xf32>
    %cst_189 = arith.constant 0.000000e+00 : f32
    %233 = vector.broadcast %cst_189 : f32 to vector<14x128xf32>
    %234 = arith.maximumf %232, %233 : vector<14x128xf32>
    %c0_190 = arith.constant 0 : index
    %c0_191 = arith.constant 0 : index
    %235 = vector.load %arg5[%c0_190, %c0_191] : memref<14x128xf32, #tpu.memory_space<vmem>>, vector<14x128xf32>
    %236 = arith.mulf %234, %235 : vector<14x128xf32>
    %cst_192 = arith.constant dense<0xFF800000> : vector<128xf32>
    %237 = vector.multi_reduction <maximumf>, %236, %cst_192 [0] : vector<14x128xf32> to vector<128xf32>
    %238 = vector.shape_cast %237 : vector<128xf32> to vector<1x128xf32>
    %c0_193 = arith.constant 0 : index
    %c0_194 = arith.constant 0 : index
    %239 = vector.load %arg6[%c0_193, %c0_194] : memref<128x128xf32, #tpu.memory_space<vmem>>, vector<128x128xf32>
    %cst_195 = arith.constant dense<0.000000e+00> : vector<1x128xf32>
    %240 = tpu.matmul %238, %239, %cst_195 {dimension_numbers = #tpu.dot_dimension_numbers<[1], [0], [0], [1], [0, 0, 1, 1], [], []>} : vector<1x128xf32>, vector<128x128xf32>, vector<1x128xf32> -> vector<1x128xf32>
    %c0_196 = arith.constant 0 : index
    %c0_197 = arith.constant 0 : index
    %241 = vector.load %arg7[%c0_196, %c0_197] : memref<1x128xf32, #tpu.memory_space<vmem>>, vector<1x128xf32>
    %242 = arith.addf %240, %241 : vector<1x128xf32>
    %243 = vector.shape_cast %242 : vector<1x128xf32> to vector<1x1x128xf32>
    %c0_198 = arith.constant 0 : index
    %c0_199 = arith.constant 0 : index
    %c0_200 = arith.constant 0 : index
    %244 = vector.load %arg8[%c0_198, %c0_199, %c0_200] : memref<1x1x128xf32, #tpu.memory_space<vmem>>, vector<1x1x128xf32>
    tpu.vector_store %arg8[%c0_198, %c0_199, %c0_200], %243 {strides = array<i32>} : memref<1x1x128xf32, #tpu.memory_space<vmem>>, vector<1x1x128xf32>,
    return
  }
  func.func @transform_1(%arg0: i32, %arg1: memref<36xi32, #tpu.memory_space<smem>>) -> (i32, i32, i32) {
    %c0_i32 = arith.constant 0 : i32
    %c0_i32_0 = arith.constant 0 : i32
    %c0_i32_1 = arith.constant 0 : i32
    %c0_i32_2 = arith.constant 0 : i32
    return %c0_i32, %c0_i32_0, %c0_i32_1 : i32, i32, i32
  }
  func.func @transform_2(%arg0: i32, %arg1: memref<36xi32, #tpu.memory_space<smem>>) -> (i32, i32) {
    %c0_i32 = arith.constant 0 : i32
    %c0_i32_0 = arith.constant 0 : i32
    %c0_i32_1 = arith.constant 0 : i32
    return %c0_i32, %c0_i32_0 : i32, i32
  }
  func.func @transform_3(%arg0: i32, %arg1: memref<36xi32, #tpu.memory_space<smem>>) -> (i32, i32) {
    %c0_i32 = arith.constant 0 : i32
    %c0_i32_0 = arith.constant 0 : i32
    %c0_i32_1 = arith.constant 0 : i32
    return %c0_i32, %c0_i32_0 : i32, i32
  }
  func.func @transform_4(%arg0: i32, %arg1: memref<36xi32, #tpu.memory_space<smem>>) -> (i32, i32) {
    %c0_i32 = arith.constant 0 : i32
    %c0_i32_0 = arith.constant 0 : i32
    %c0_i32_1 = arith.constant 0 : i32
    return %c0_i32, %c0_i32_0 : i32, i32
  }
  func.func @transform_5(%arg0: i32, %arg1: memref<36xi32, #tpu.memory_space<smem>>) -> (i32, i32) {
    %c0_i32 = arith.constant 0 : i32
    %c0_i32_0 = arith.constant 0 : i32
    %c0_i32_1 = arith.constant 0 : i32
    return %c0_i32, %c0_i32_0 : i32, i32
  }
  func.func @transform_6(%arg0: i32, %arg1: memref<36xi32, #tpu.memory_space<smem>>) -> (i32, i32, i32) {
    %c0_i32 = arith.constant 0 : i32
    %c0_i32_0 = arith.constant 0 : i32
    %c0_i32_1 = arith.constant 0 : i32
    return %arg0, %c0_i32, %c0_i32_0 : i32, i32, i32
  }
}

</mosaic_0001>

<bundles_post_ra>
// kernel: forward.1
= control target key start
LH: loop header
LB: loop body
LE: loop exit
PB: predicated region body
PF: predicated region fallthrough
CT: control target
= control target key end

     0   :  { %s2721_s0 = inlined_call_operand.vmem [shape: s32[36], index: 0, kind: input, shape index: {}]   ;;  %s2722_s1 = inlined_call_operand.vmem [shape: f32[50,32], index: 1, kind: input, shape index: {}]   ;;  %s2723_s2 = inlined_call_operand.vmem [shape: bf16[5,32,128], index: 2, kind: input, shape index: {}]   ;;  %s2724_s3 = inlined_call_operand.vmem [shape: f32[1,128], index: 3, kind: input, shape index: {}]   ;;  %s2725_s4 = inlined_call_operand.vmem [shape: f32[14,128], index: 4, kind: input, shape index: {}]   ;;  %s2726_s5 = inlined_call_operand.hbm [shape: f32[128,128], index: 5, kind: input, shape index: {}]   ;;  %s2727_s6 = inlined_call_operand.vmem [shape: f32[1,128], index: 6, kind: input, shape index: {}]   ;;  %s2728_s7 = inlined_call_operand.hbm [shape: f32[2,1,128], index: 7, kind: output, shape index: {}]  }
   0x1   :  { %s12_s26 = sshll.u32 %s2721_s0, 4  ;;  %s13_s26 = int_to_ptr.vmem [resolvable:$true] %s12_s26 }
   0x2   :  { %s2255_s27 = scalar_lea.vmem %s13_s26, 16  ;;  %p2260_p1 = scmp.lt.s32.totalorder %s13_s26, %s13_s26 }
   0x3   :  { %p2256_p0 = scmp.ne.s32.totalorder %s13_s26, %s2255_s27  ;;  %p2261_p2 = scmp.lt.s32.totalorder %s2255_s27, %s2255_s27 }
   0x5   :  { %p2262_p3 = por %p2261_p2, %p2260_p1 }
   0x7   :  { %p2263_p4 = pnand %p2262_p3, %p2256_p0 }
   0x9   :  { %2266 = shalt.err (!%p2263_p4)  }
   0xa   :  { %s2397_s28 = smov [#allocation5]  }
   0xb   :  { %15 = dma.vmem_to_smem %s13_s26, 16, %s2397_s28, [#allocation4] }
   0xc   :  { %2335 = dma.done.wait [#allocation4], 16 }
   0xd   :  { %2336 = vsyncadd [#allocation4], 4294967280 }
   0xe   :  { %17 = sfence }
   0xf   :  { %18 = vsyncpa [#allocation7], 0 }
  0x10   :  { %19 = vsyncpa [#allocation8], 0 }
  0x11   :  { %21 = vsyncpa [#allocation8 + $0x1], 0  ;;  %s2447_s29 = smov 0   ;;  %s2449_s30 = smov 0  }
  0x12   :  { %s2451_s0 = smov 0   ;;  %s2453_s8 = smov 0  }
  0x13 LB: > { %s2468_s9 = sadd.s32 4294967295, %s2395_s8   ;;  %s2025_s10 = sadd.s32 4294967294, %s2395_s8   ;;  %s2395_s8 = sphi %s2453_s8, %s2738_s8   ;;  %s2391_s0 = sphi %s2451_s0, %s2737_s0   ;;  %s2387_s30 = sphi %s2449_s30, %s2736_s30   ;;  %s2383_s29 = sphi %s2447_s29, %s2735_s29  }
  0x14   : > { %s2472_s11 = sadd.s32 1, %s2395_s8   ;;  %s139_s12 = sadd.s32 1, %s2391_s0 }
  0x15   : > { %s136_s13 = ssub.s32 %s2395_s8, %s2472_s11  ;;  %p149_p5 = scmp.ne.s32.totalorder %s2391_s0, %s2387_s30 }
  0x16   : > { %p137_p6 = scmp.eq.s32.totalorder %s136_s13, 0  ;;  %p150_p7 = scmp.eq.s32.totalorder %s2468_s9, 1 }
  0x17   : > { %p155_p8 = scmp.ne.s32.totalorder %s2387_s30, %s2383_s29  ;;  %p156_p9 = scmp.eq.s32.totalorder %s2025_s10, 1 }
  0x18   : > { %s2483_s14 = scalar_select %p137_p6, %s2391_s0, %s139_s12  }
  0x19   : > { %p2485_p10 = por %p150_p7, %p149_p5  ;;  %p2489_p11 = por %p156_p9, %p155_p8 }
  0x1a   : > { %p2026_p12 = scmp.ge.s32.totalorder %s2395_s8, 1  ;;  %p163_p13 = scmp.lt.s32.totalorder %s2395_s8, 3 }
  0x1b   : > { %s2731_s16 = scalar_select %p2489_p11, 1, 0 }
  0x1c   : > { %p2204_p0 = scmp.eq.s32.totalorder %s2468_s9, 0  ;;  %p2496_p1 = pnand %p2026_p12, %p163_p13 }
  0x1d   : > { %s2398_s18 = smov [#allocation6]  }
  0x1e   : > { %s184_s19 = sshll.u32 %s2398_s18, 4  ;;  %p2196_p2 = pneg %p2496_p1  ;;  %s185_s19 = int_to_ptr.vmem [resolvable:$true] %s184_s19 }
  0x1f   : > { %s2278_s20 = scalar_lea.vmem %s185_s19, 2048  ;;  %p2286_p8 = scmp.lt.s32.totalorder %s185_s19, %s185_s19 }
  0x20   : > { %p2197_p3 = pnand %p2204_p0, %p2196_p2  ;;  %p2279_p5 = scmp.ne.s32.totalorder %s185_s19, %s2278_s20 }
  0x21   : > { %p2287_p9 = scmp.lt.s32.totalorder %s2278_s20, %s2278_s20 }
  0x22   : > { %p2269_p4 = pneg %p2197_p3 }
  0x23   : > { %p2288_p11 = por %p2287_p9, %p2286_p8 }
  0x24   : > { %p2281_p6 = pnand %p2279_p5, %p2269_p4 }
  0x26   : > { %p2282_p7 = pneg %p2281_p6 }
  0x28   : > { %p2289_p12 = pnand %p2288_p11, %p2282_p7 }
  0x2a   : > { %2292 = shalt.err (!%p2289_p12)
}
  0x2b   : > { %s2399_s21 = smov 128   ;;  %s2400_s22 = smov 8  }
  0x2c   : > { %2199 = dma.hbm_to_vmem [thread:$0]  (!%p2197_p3), %s2726_s5, 2048, %s185_s19, [#allocation7], %s2399_s21, %s2399_s21, %s2400_s22  }
  0x2d   : > { %203 = sbr.rel (%p2496_p1) target bundleno = 730 (0x2da), region = 40 }
  0x32   : > { %2338 = dma.done.wait (%p2204_p0), [#allocation7], 2048  }
  0x33   : > { %2340 = vsyncadd (%p2204_p0), [#allocation7], 4294965248  ;;  %s2514_s25 = smul.u32 18, %s2468_s9  ;;  %s2729_s26 = sand.u32 1, %s2387_s30  }
  0x34   : > { %s2523_s13 = scalar_lea.vmem [#allocation9], %s2729_s26 }
  0x35   : > { %s227_s27 = sld [smem:[#allocation5 + %s2514_s25]] }
  0x3b   : > { %s228_s12 = scalar_lea.vmem %s2722_s1, %s227_s27 }
  0x3c   : > { %v247_v0 = vld [vmem:[%s228_s12] sm:$0x1] }
  0x3d   : > { %248 = vst [vmem:[#allocation2] sm:$0x1] %v247_v0 }
  0x3e   : > { %274 = vsyncadd [#allocation3], 16  ;;  %s275_s17 = sadd.s32 1, %s2514_s25 }
  0x3f   : > { %s276_s18 = sld [smem:[#allocation5 + %s275_s17]] }
  0x45   : > { %s277_s21 = scalar_lea.vmem %s2722_s1, %s276_s18 }
  0x46   : > { %v298_v1 = vld [vmem:[%s277_s21] sm:$0x1] }
  0x47   : > { %299 = vst [vmem:[#allocation2 + $0x1] sm:$0x1] %v298_v1 }
  0x48   : > { %325 = vsyncadd [#allocation3 + $0x1], 16  ;;  %s326_s22 = sadd.s32 2, %s2514_s25 }
  0x49   : > { %s327_s23 = sld [smem:[#allocation5 + %s326_s22]] }
  0x4f   : > { %s328_s28 = scalar_lea.vmem %s2722_s1, %s327_s23 }
  0x50   : > { %v349_v2 = vld [vmem:[%s328_s28] sm:$0x1] }
  0x51   : > { %350 = vst [vmem:[#allocation2 + $0x2] sm:$0x1] %v349_v2 }
  0x52   : > { %376 = vsyncadd [#allocation3 + $0x2], 16  ;;  %s377_s10 = sadd.s32 3, %s2514_s25 }
  0x53   : > { %s378_s12 = sld [smem:[#allocation5 + %s377_s10]] }
  0x59   : > { %s379_s18 = scalar_lea.vmem %s2722_s1, %s378_s12 }
  0x5a   : > { %v400_v3 = vld [vmem:[%s379_s18] sm:$0x1] }
  0x5b   : > { %401 = vst [vmem:[#allocation2 + $0x3] sm:$0x1] %v400_v3 }
  0x5c   : > { %427 = vsyncadd [#allocation3 + $0x3], 16  ;;  %s428_s19 = sadd.s32 4, %s2514_s25 }
  0x5d   : > { %s429_s20 = sld [smem:[#allocation5 + %s428_s19]] }
  0x63   : > { %s430_s23 = scalar_lea.vmem %s2722_s1, %s429_s20 }
  0x64   : > { %v451_v4 = vld [vmem:[%s430_s23] sm:$0x1] }
  0x65   : > { %452 = vst [vmem:[#allocation2 + $0x4] sm:$0x1] %v451_v4 }
  0x66   : > { %478 = vsyncadd [#allocation3 + $0x4], 16  ;;  %s479_s24 = sadd.s32 5, %s2514_s25 }
  0x67   : > { %s480_s27 = sld [smem:[#allocation5 + %s479_s24]] }
  0x6d   : > { %s481_s26 = scalar_lea.vmem %s2722_s1, %s480_s27 }
  0x6e   : > { %v502_v5 = vld [vmem:[%s481_s26] sm:$0x1] }
  0x6f   : > { %503 = vst [vmem:[#allocation2 + $0x5] sm:$0x1] %v502_v5 }
  0x70   : > { %529 = vsyncadd [#allocation3 + $0x5], 16  ;;  %s530_s12 = sadd.s32 6, %s2514_s25 }
  0x71   : > { %s531_s17 = sld [smem:[#allocation5 + %s530_s12]] }
  0x77   : > { %s532_s20 = scalar_lea.vmem %s2722_s1, %s531_s17 }
  0x78   : > { %v553_v6 = vld [vmem:[%s532_s20] sm:$0x1] }
  0x79   : > { %554 = vst [vmem:[#allocation2 + $0x6] sm:$0x1] %v553_v6 }
  0x7a   : > { %580 = vsyncadd [#allocation3 + $0x6], 16  ;;  %s581_s21 = sadd.s32 7, %s2514_s25 }
  0x7b   : > { %s582_s22 = sld [smem:[#allocation5 + %s581_s21]] }
  0x81   : > { %s583_s27 = scalar_lea.vmem %s2722_s1, %s582_s22 }
  0x82   : > { %v604_v7 = vld [vmem:[%s583_s27] sm:$0x1] }
  0x83   : > { %605 = vst [vmem:[#allocation2 + $0x7] sm:$0x1] %v604_v7 }
  0x84   : > { %631 = vsyncadd [#allocation3 + $0x7], 16  ;;  %s632_s28 = sadd.s32 8, %s2514_s25 }
  0x85   : > { %s633_s10 = sld [smem:[#allocation5 + %s632_s28]] }
  0x8b   : > { %s634_s17 = scalar_lea.vmem %s2722_s1, %s633_s10 }
  0x8c   : > { %v655_v8 = vld [vmem:[%s634_s17] sm:$0x1] }
  0x8d   : > { %656 = vst [vmem:[#allocation2 + $0x8] sm:$0x1] %v655_v8 }
  0x8e   : > { %682 = vsyncadd [#allocation3 + $0x8], 16  ;;  %s683_s18 = sadd.s32 9, %s2514_s25 }
  0x8f   : > { %s684_s19 = sld [smem:[#allocation5 + %s683_s18]] }
  0x95   : > { %s685_s22 = scalar_lea.vmem %s2722_s1, %s684_s19 }
  0x96   : > { %v706_v9 = vld [vmem:[%s685_s22] sm:$0x1] }
  0x97   : > { %707 = vst [vmem:[#allocation2 + $0x9] sm:$0x1] %v706_v9 }
  0x98   : > { %733 = vsyncadd [#allocation3 + $0x9], 16  ;;  %s734_s23 = sadd.s32 10, %s2514_s25 }
  0x99   : > { %s735_s24 = sld [smem:[#allocation5 + %s734_s23]] }
  0x9f   : > { %s736_s10 = scalar_lea.vmem %s2722_s1, %s735_s24 }
  0xa0   : > { %v757_v10 = vld [vmem:[%s736_s10] sm:$0x1] }
  0xa1   : > { %758 = vst [vmem:[#allocation2 + $0xa] sm:$0x1] %v757_v10 }
  0xa2   : > { %784 = vsyncadd [#allocation3 + $0xa], 16  ;;  %s785_s26 = sadd.s32 11, %s2514_s25 }
  0xa3   : > { %s786_s12 = sld [smem:[#allocation5 + %s785_s26]] }
  0xa9   : > { %s787_s19 = scalar_lea.vmem %s2722_s1, %s786_s12 }
  0xaa   : > { %v808_v11 = vld [vmem:[%s787_s19] sm:$0x1] }
  0xab   : > { %809 = vst [vmem:[#allocation2 + $0xb] sm:$0x1] %v808_v11 }
  0xac   : > { %835 = vsyncadd [#allocation3 + $0xb], 16  ;;  %s836_s20 = sadd.s32 12, %s2514_s25 }
  0xad   : > { %s837_s21 = sld [smem:[#allocation5 + %s836_s20]] }
  0xb3   : > { %s838_s24 = scalar_lea.vmem %s2722_s1, %s837_s21 }
  0xb4   : > { %v859_v12 = vld [vmem:[%s838_s24] sm:$0x1] }
  0xb5   : > { %860 = vst [vmem:[#allocation2 + $0xc] sm:$0x1] %v859_v12 }
  0xb6   : > { %886 = vsyncadd [#allocation3 + $0xc], 16  ;;  %s887_s27 = sadd.s32 13, %s2514_s25 }
  0xb7   : > { %s888_s28 = sld [smem:[#allocation5 + %s887_s27]] }
  0xbd   : > { %s889_s12 = scalar_lea.vmem %s2722_s1, %s888_s28 }
  0xbe   : > { %v910_v13 = vld [vmem:[%s889_s12] sm:$0x1] }
  0xbf   : > { %911 = vst [vmem:[#allocation2 + $0xd] sm:$0x1] %v910_v13 }
  0xc0   : > { %937 = vsyncadd [#allocation3 + $0xd], 16  ;;  %s938_s17 = sadd.s32 14, %s2514_s25 }
  0xc1   : > { %s939_s18 = sld [smem:[#allocation5 + %s938_s17]] }
  0xc7   : > { %s940_s21 = scalar_lea.vmem %s2722_s1, %s939_s18 }
  0xc8   : > { %v961_v14 = vld [vmem:[%s940_s21] sm:$0x1] }
  0xc9   : > { %962 = vst [vmem:[#allocation2 + $0xe] sm:$0x1] %v961_v14 }
  0xca   : > { %988 = vsyncadd [#allocation3 + $0xe], 16  ;;  %s989_s22 = sadd.s32 15, %s2514_s25 }
  0xcb   : > { %s990_s23 = sld [smem:[#allocation5 + %s989_s22]] }
  0xd1   : > { %s991_s28 = scalar_lea.vmem %s2722_s1, %s990_s23 }
  0xd2   : > { %v1012_v15 = vld [vmem:[%s991_s28] sm:$0x1] }
  0xd3   : > { %1013 = vst [vmem:[#allocation2 + $0xf] sm:$0x1] %v1012_v15 }
  0xd4   : > { %1039 = vsyncadd [#allocation3 + $0xf], 16  ;;  %s1040_s10 = sadd.s32 16, %s2514_s25 }
  0xd5   : > { %s1041_s26 = sld [smem:[#allocation5 + %s1040_s10]] }
  0xdb   : > { %s1042_s18 = scalar_lea.vmem %s2722_s1, %s1041_s26 }
  0xdc   : > { %v1063_v16 = vld [vmem:[%s1042_s18] sm:$0x1] }
  0xdd   : > { %1064 = vst [vmem:[#allocation2 + $0x10] sm:$0x1] %v1063_v16 }
  0xde   : > { %1090 = vsyncadd [#allocation3 + $0x10], 16  ;;  %s1091_s19 = sadd.s32 17, %s2514_s25 }
  0xdf   : > { %s1092_s20 = sld [smem:[#allocation5 + %s1091_s19]] }
  0xe5   : > { %s1093_s23 = scalar_lea.vmem %s2722_s1, %s1092_s20 }
  0xe6   : > { %v1114_v17 = vld [vmem:[%s1093_s23] sm:$0x1] }
  0xe7   : > { %1115 = vst [vmem:[#allocation2 + $0x11] sm:$0x1] %v1114_v17 }
  0xe8   : > { %1141 = vsyncadd [#allocation3 + $0x11], 16 }
  0xe9   : > { %2341 = dma.done.wait [#allocation3], 16 }
  0xea   : > { %2342 = vsyncadd [#allocation3], 4294967280 }
  0xeb   : > { %2343 = dma.done.wait [#allocation3 + $0x1], 16 }
  0xec   : > { %2344 = vsyncadd [#allocation3 + $0x1], 4294967280 }
  0xed   : > { %2345 = dma.done.wait [#allocation3 + $0x2], 16 }
  0xee   : > { %2346 = vsyncadd [#allocation3 + $0x2], 4294967280 }
  0xef   : > { %2347 = dma.done.wait [#allocation3 + $0x3], 16 }
  0xf0   : > { %2348 = vsyncadd [#allocation3 + $0x3], 4294967280 }
  0xf1   : > { %2349 = dma.done.wait [#allocation3 + $0x4], 16 }
  0xf2   : > { %2350 = vsyncadd [#allocation3 + $0x4], 4294967280 }
  0xf3   : > { %2351 = dma.done.wait [#allocation3 + $0x5], 16 }
  0xf4   : > { %2352 = vsyncadd [#allocation3 + $0x5], 4294967280 }
  0xf5   : > { %2353 = dma.done.wait [#allocation3 + $0x6], 16 }
  0xf6   : > { %2354 = vsyncadd [#allocation3 + $0x6], 4294967280 }
  0xf7   : > { %2355 = dma.done.wait [#allocation3 + $0x7], 16 }
  0xf8   : > { %2356 = vsyncadd [#allocation3 + $0x7], 4294967280 }
  0xf9   : > { %2357 = dma.done.wait [#allocation3 + $0x8], 16 }
  0xfa   : > { %2358 = vsyncadd [#allocation3 + $0x8], 4294967280 }
  0xfb   : > { %2359 = dma.done.wait [#allocation3 + $0x9], 16 }
  0xfc   : > { %2360 = vsyncadd [#allocation3 + $0x9], 4294967280 }
  0xfd   : > { %2361 = dma.done.wait [#allocation3 + $0xa], 16 }
  0xfe   : > { %2362 = vsyncadd [#allocation3 + $0xa], 4294967280 }
  0xff   : > { %2363 = dma.done.wait [#allocation3 + $0xb], 16 }
 0x100   : > { %2364 = vsyncadd [#allocation3 + $0xb], 4294967280 }
 0x101   : > { %2365 = dma.done.wait [#allocation3 + $0xc], 16 }
 0x102   : > { %2366 = vsyncadd [#allocation3 + $0xc], 4294967280 }
 0x103   : > { %2367 = dma.done.wait [#allocation3 + $0xd], 16 }
 0x104   : > { %2368 = vsyncadd [#allocation3 + $0xd], 4294967280 }
 0x105   : > { %2369 = dma.done.wait [#allocation3 + $0xe], 16 }
 0x106   : > { %2370 = vsyncadd [#allocation3 + $0xe], 4294967280 }
 0x107   : > { %2371 = dma.done.wait [#allocation3 + $0xf], 16 }
 0x108   : > { %2372 = vsyncadd [#allocation3 + $0xf], 4294967280 }
 0x109   : > { %2373 = dma.done.wait [#allocation3 + $0x10], 16 }
 0x10a   : > { %2374 = vsyncadd [#allocation3 + $0x10], 4294967280 }
 0x10b   : > { %2375 = dma.done.wait [#allocation3 + $0x11], 16 }
 0x10c   : > { %2376 = vsyncadd [#allocation3 + $0x11], 4294967280  ;;  %v2401_v18 = vmov 0.0   ;;  %vm2402_vm0 = vmmov 0   ;;  %v2245_v19 = vld [vmem:[%s2723_s2 + $0x18] sm:$0xff]   ;;  %v2246_v20 = vld [vmem:[%s2723_s2 + $0x10] sm:$0xff]  }
 0x10d   : > { %2115 = vmatprep.subr.bf16.mxu0 %v2401_v18  ;;  %2119 = vmatprep.mubr.msk.bf16.mxu0 %vm2402_vm0, %v2401_v18  ;;  %v1186_v21 = vld [vmem:[#allocation2 + $0x1] sm:$0xff]  ;;  %v1187_v22 = vld [vmem:[#allocation2 + $0x9] sm:$0x3f]  ;;  %vm1206_vm1 = vcmask 261120   ;;  %v2250_v25 = vld [vmem:[%s2723_s2 + $0x38] sm:$0xff]   ;;  %vm1520_vm2 = vcmask 1045504  }
 0x10e   : > { %2139 = vmatprep.subr.bf16.mxu1 %v2401_v18  ;;  %2143 = vmatprep.mubr.msk.bf16.mxu1 %vm2402_vm0, %v2401_v18  ;;  %v1188_v23 = vpack.c.bf16 %v1187_v22, %v1186_v21  ;;  %v2247_v24 = vld [vmem:[%s2723_s2 + $0x8] sm:$0xff]   ;;  %v2248_v26 = vld [vmem:[%s2723_s2] sm:$0xff]   ;;  %v2252_v29 = vld [vmem:[%s2723_s2 + $0x30] sm:$0xff]   ;;  %s2062_s25 = sshll.u32 %s2468_s9, 4  ;;  %s1630_s24 = sshll.u32 %s2523_s13, 4  ;;  %s1631_s24 = int_to_ptr.vmem [resolvable:$true] %s1630_s24 }
 0x10f   : > { %2116 = vmatpush3.bf16.msra.mxu0 %v2245_v19  ;;  %v1179_v27 = vld [vmem:[#allocation2] sm:$0xff]  ;;  %v1180_v28 = vld [vmem:[#allocation2 + $0x8] sm:$0x3f]  ;;  %2140 = vmatpush3.bf16.msra.mxu1 %v2250_v25  ;;  %v1544_v44 = vld [vmem:[#allocation6 + $0x78] sm:$0xff]  ;;  %s2683_s10 = scalar_lea.hbm %s2728_s7, %s2062_s25  ;;  %s2733_s26 = sand.u32 1, %s2387_s30  }
 0x110   : > { %2117 = vmatprep.subr.bf16.mxu0 %v2401_v18  ;;  %v1373_v30 = vld [vmem:[#allocation2 + $0x3] sm:$0xff]  ;;  %v1374_v31 = vld [vmem:[#allocation2 + $0xb] sm:$0x3f]  ;;  %2141 = vmatprep.subr.bf16.mxu1 %v2401_v18  ;;  %v1181_v33 = vpack.c.bf16 %v1180_v28, %v1179_v27  ;;  %v1541_v47 = vld [vmem:[#allocation6 + $0x60] sm:$0xff]  ;;  %s1618_s12 = scalar_lea.sflag [#allocation8], %s2733_s26  ;;  %s2293_s17 = scalar_lea.vmem %s1631_s24, 16 }
 0x111   : > { %v1375_v32 = vpack.c.bf16 %v1374_v31, %v1373_v30  ;;  %v2249_v34 = vld [vmem:[%s2723_s2 + $0x28] sm:$0xff]   ;;  %v2251_v35 = vld [vmem:[%s2723_s2 + $0x20] sm:$0xff]   ;;  %v1540_v48 = vld [vmem:[#allocation6 + $0x58] sm:$0xff]  ;;  %p2294_p11 = scmp.ne.s32.totalorder %s1631_s24, %s2293_s17  ;;  %s2403_s18 = smov [#allocation9]  }
 0x112   : > { %v1307_v36 = vld [vmem:[#allocation2 + $0x2] sm:$0xff]  ;;  %v1308_v37 = vld [vmem:[#allocation2 + $0xa] sm:$0x3f]  ;;  %v1537_v51 = vld [vmem:[#allocation6 + $0x40] sm:$0xff]  ;;  %s2297_s9 = sshll.u32 %s2403_s18, 4  ;;  %s2298_s9 = int_to_ptr.vmem [resolvable:$false] %s2297_s9 }
 0x113   : > { %2118 = vmatpush3.bf16.msra.mxu0 %v2246_v20  ;;  %2142 = vmatpush3.bf16.msra.mxu1 %v2252_v29  ;;  %v1309_v38 = vpack.c.bf16 %v1308_v37, %v1307_v36  ;;  %v2253_v39 = vld [vmem:[%s2723_s2 + $0x48] sm:$0xff]   ;;  %v2254_v40 = vld [vmem:[%s2723_s2 + $0x40] sm:$0xff]   ;;  %v1536_v52 = vld [vmem:[#allocation6 + $0x38] sm:$0xff]  ;;  %p2295_p13 = pnand %p2294_p11, %p2485_p10  ;;  %s2299_s19 = scalar_lea.vmem %s2298_s9, 32 }
 0x114   : > { %2123 = vmatprep.subr.bf16.mxu0 %v2401_v18  ;;  %2155 = vmatprep.subr.mxu1 %v2401_v18  ;;  %v1439_v41 = vld [vmem:[#allocation2 + $0x4] sm:$0xff]  ;;  %v1440_v42 = vld [vmem:[#allocation2 + $0xc] sm:$0x3f]  ;;  %v1533_v55 = vld [vmem:[#allocation6 + $0x20] sm:$0xff]  ;;  %p2300_p1 = scmp.lt.s32.totalorder %s1631_s24, %s2298_s9  ;;  %p2301_p2 = scmp.lt.s32.totalorder %s2299_s19, %s2293_s17 }
 0x115   : > { %v1441_v43 = vpack.c.bf16 %v1440_v42, %v1439_v41  ;;  %v1543_v45 = vld [vmem:[#allocation6 + $0x70] sm:$0xff]  ;;  %v1542_v46 = vld [vmem:[#allocation6 + $0x68] sm:$0xff]  ;;  %v1532_v56 = vld [vmem:[#allocation6 + $0x18] sm:$0xff]  ;;  %p2296_p0 = pneg %p2295_p13 }
 0x116   : > { %2120 = vmatmul.mubr.msk.bf16.vlgmr.msra.gmra.mxu0 %vm1206_vm1, %v1188_v23  ;;  %2144 = vmatmul.mubr.msk.bf16.vlgmr.msra.gmra.mxu1 %vm1206_vm1, %v1375_v32  ;;  %v1539_v49 = vld [vmem:[#allocation6 + $0x50] sm:$0xff]  ;;  %v1538_v50 = vld [vmem:[#allocation6 + $0x48] sm:$0xff]  ;;  %v1529_v59 = vld [vmem:[#allocation6] sm:$0xff]  ;;  %p2302_p3 = por %p2301_p2, %p2300_p1 }
 0x117   : > { %2124 = vmatpush3.bf16.msra.mxu0 %v2247_v24  ;;  %2127 = vmatprep.mubr.msk.bf16.mxu0 %vm2402_vm0, %v2401_v18  ;;  %v1535_v53 = vld [vmem:[#allocation6 + $0x30] sm:$0xff]  ;;  %v1534_v54 = vld [vmem:[#allocation6 + $0x28] sm:$0xff] }
 0x118   : > { %2125 = vmatprep.subr.bf16.mxu0 %v2401_v18  ;;  %2187 = vmatprep.mubr.msk.f32.mxu1 %vm2402_vm0, %v2401_v18  ;;  %v1531_v57 = vld [vmem:[#allocation6 + $0x10] sm:$0xff]  ;;  %v1530_v58 = vld [vmem:[#allocation6 + $0x8] sm:$0xff]  ;;  %p2303_p4 = pnand %p2302_p3, %p2296_p0 }
 0x119   : > { %2156 = vmatpush3.msra.mxu1 %v1544_v44  ;;  %v2061_v19 = vld [vmem:[%s2724_s3] ss:$0 sm:$0xff]  ;;  %v1517_v28 = vld [vmem:[%s2725_s4 + $0x8] sm:$0x3f] }
 0x11a   : > { %2157 = vmatprep.subr.mxu1 %v2401_v18  ;;  %v1516_v29 = vld [vmem:[%s2725_s4] sm:$0xff] }
 0x11b   : > { %2126 = vmatpush3.bf16.msra.mxu0 %v2248_v26  ;;  %2158 = vmatpush3.msra.mxu1 %v1543_v45  ;;  %v1545_v41 = vld [vmem:[%s2727_s6] sm:$0x1] }
 0x11c   : > { %2131 = vmatprep.subr.bf16.mxu0 %v2401_v18  ;;  %2159 = vmatprep.subr.mxu1 %v2401_v18 }
 0x11d   : > { %2160 = vmatpush3.msra.mxu1 %v1542_v46 }
 0x11e   : > { %2128 = vmatmul.mubr.msk.bf16.vlgmr.msra.gmra.mxu0 %vm1206_vm1, %v1181_v33  ;;  %2161 = vmatprep.subr.mxu1 %v2401_v18 }
 0x11f   : > { %2132 = vmatpush3.bf16.msra.mxu0 %v2249_v34  ;;  %2135 = vmatprep.mubr.msk.bf16.mxu0 %vm2402_vm0, %v2401_v18 }
 0x120   : > { %2133 = vmatprep.subr.bf16.mxu0 %v2401_v18  ;;  %2162 = vmatpush3.msra.mxu1 %v1541_v47 }
 0x121   : > { %2163 = vmatprep.subr.mxu1 %v2401_v18 }
 0x122   : > { %2164 = vmatpush3.msra.mxu1 %v1540_v48 }
 0x123   : > { %2134 = vmatpush3.bf16.msra.mxu0 %v2251_v35  ;;  %2165 = vmatprep.subr.mxu1 %v2401_v18 }
 0x124   : > { %2147 = vmatprep.subr.bf16.mxu0 %v2401_v18  ;;  %2166 = vmatpush3.msra.mxu1 %v1539_v49 }
 0x125   : > { %2167 = vmatprep.subr.mxu1 %v2401_v18 }
 0x126   : > { %2136 = vmatmul.mubr.msk.bf16.vlgmr.msra.gmra.mxu0 %vm1206_vm1, %v1309_v38  ;;  %2168 = vmatpush3.msra.mxu1 %v1538_v50 }
 0x127   : > { %2148 = vmatpush3.bf16.msra.mxu0 %v2253_v39  ;;  %2151 = vmatprep.mubr.msk.bf16.mxu0 %vm2402_vm0, %v2401_v18 }
 0x128   : > { %2149 = vmatprep.subr.bf16.mxu0 %v2401_v18  ;;  %2169 = vmatprep.subr.mxu1 %v2401_v18 }
 0x129   : > { %2170 = vmatpush3.msra.mxu1 %v1537_v51 }
 0x12a   : > { %2171 = vmatprep.subr.mxu1 %v2401_v18 }
 0x12b   : > { %2150 = vmatpush3.bf16.msra.mxu0 %v2254_v40  ;;  %2172 = vmatpush3.msra.mxu1 %v1536_v52 }
 0x12c   : > { %2173 = vmatprep.subr.mxu1 %v2401_v18 }
 0x12d   : > { %2174 = vmatpush3.msra.mxu1 %v1535_v53 }
 0x12e   : > { %2152 = vmatmul.mubr.msk.bf16.vlgmr.msra.gmra.mxu0 %vm1206_vm1, %v1441_v43  ;;  %2175 = vmatprep.subr.mxu1 %v2401_v18 }
 0x12f   : > { %2176 = vmatpush3.msra.mxu1 %v1534_v54 }
 0x130   : > { %2177 = vmatprep.subr.mxu1 %v2401_v18 }
 0x131   : > { %2178 = vmatpush3.msra.mxu1 %v1533_v55 }
 0x132   : > { %2179 = vmatprep.subr.mxu1 %v2401_v18 }
 0x133   : > { %2180 = vmatpush3.msra.mxu1 %v1532_v56 }
 0x134   : > { %2181 = vmatprep.subr.mxu1 %v2401_v18 }
 0x135   : > { %2182 = vmatpush3.msra.mxu1 %v1531_v57 }
 0x136   : > { %2183 = vmatprep.subr.mxu1 %v2401_v18 }
 0x137   : > { %2184 = vmatpush3.msra.mxu1 %v1530_v58 }
 0x138   : > { %2185 = vmatprep.subr.mxu1 %v2401_v18 }
 0x139   : > { %2186 = vmatpush3.msra.mxu1 %v1529_v59 }
 0x1d6   : > { %v1244_v60 = vpop.f32.mrf.mxu0  ;;  %v1430_v0 = vpop.f32.mrf.mxu1 }
 0x1d8   : > { %v2121_v61 = vpop.f32.mrf.mxu0  ;;  %v2145_v2 = vpop.f32.mrf.mxu1 }
 0x1da   : > { %v1247_v62 = vpop.f32.mrf.mxu0  ;;  %v1433_v4 = vpop.f32.mrf.mxu1 }
 0x1dc   : > { %v2122_v63 = vpop.f32.mrf.mxu0  ;;  %v2146_v6 = vpop.f32.mrf.mxu1 }
 0x1de   : > { %v1300_v1 = vpop.f32.mrf.mxu0 }
 0x1df   : > { %v1301_v9 = vadd.f32 %v1300_v1, %v1244_v60 }
 0x1e0   : > { %v2129_v3 = vpop.f32.mrf.mxu0 }
 0x1e2   : > { %v1303_v5 = vpop.f32.mrf.mxu0 }
 0x1e3   : > { %v1304_v13 = vadd.f32 %v1303_v5, %v1247_v62 }
 0x1e4   : > { %v2130_v7 = vpop.f32.mrf.mxu0 }
 0x1e6   : > { %v1364_v8 = vpop.f32.mrf.mxu0 }
 0x1e7   : > { %v1371_v11 = vadd.f32 %v1364_v8, %v1301_v9 }
 0x1e8   : > { %v2137_v10 = vpop.f32.mrf.mxu0 }
 0x1e9   : > { %v1437_v15 = vadd.f32 %v1430_v0, %v1371_v11 }
 0x1ea   : > { %v1367_v12 = vpop.f32.mrf.mxu0 }
 0x1eb   : > { %v1372_v16 = vadd.f32 %v1367_v12, %v1304_v13 }
 0x1ec   : > { %v2138_v14 = vpop.f32.mrf.mxu0 }
 0x1ed   : > { %v1438_v21 = vadd.f32 %v1433_v4, %v1372_v16 }
 0x1ee   : > { %v1496_v17 = vpop.f32.mrf.mxu0 }
 0x1ef   : > { %v1503_v18 = vadd.f32 %v1496_v17, %v1437_v15 }
 0x1f0   : > { %v2153_v20 = vpop.f32.mrf.mxu0 }
 0x1f1   : > { %v1512_v22 = vadd.f32 %v2061_v19, %v1503_v18 }
 0x1f2   : > { %v1499_v23 = vpop.f32.mrf.mxu0 }
 0x1f3   : > { %v1504_v24 = vadd.f32 %v1499_v23, %v1438_v21  ;;  %v1514_v27 = vmax.f32 %v1512_v22, 0.0 }
 0x1f4   : > { %v2154_v25 = vpop.f32.mrf.mxu0 }
 0x1f5   : > { %v1513_v26 = vadd.f32 %v2061_v19, %v1504_v24  ;;  %v1518_v32 = vmul.f32 %v1516_v29, %v1514_v27 }
 0x1f7   : > { %v1515_v30 = vmax.f32 %v1513_v26, 0.0 }
 0x1f9   : > { %v1519_v31 = vmul.f32 %v1517_v28, %v1515_v30 }
 0x1fb   : > { %v1521_v33 = vsel %vm1520_vm2, %v1519_v31, -inf }
 0x1fc   : > { %v1522_v34 = vmax.f32 %v1518_v32, %v1521_v33 }
 0x1fe   : > { %v1523_v35 = vrot.slane %v1522_v34, 4 }
 0x200   : > { %v1524_v36 = vmax.f32 %v1522_v34, %v1523_v35 }
 0x202   : > { %v1525_v37 = vrot.slane %v1524_v36, 2 }
 0x204   : > { %v1526_v38 = vmax.f32 %v1524_v36, %v1525_v37 }
 0x206   : > { %v1527_v39 = vrot.slane %v1526_v38, 1 }
 0x208   : > { %v1528_v40 = vmax.f32 %v1526_v38, %v1527_v39 }
 0x20a   : > { %2188 = vmatmul.mubr.f32.vlgmr.msra.gmra.mxu1 %v1528_v40 }
 0x2ca   : > { %v1612_v42 = vpop.f32.mrf.mxu1 }
 0x2cb   : > { %v1613_v43 = vadd.f32 %v1612_v42, %v1545_v41 }
 0x2cc   : > { %v2189_v44 = vpop.f32.mrf.mxu1 }
 0x2cd   : > { %1616 = vst [vmem:[%s2523_s13] sm:$0x1] %v1613_v43 }
 0x2ce   : > { %2306 = shalt.err (!%p2303_p4)
}
 0x2cf   : > { %s2307_s13 = scalar_lea.hbm %s2683_s10, 16  ;;  %s2311_s22 = scalar_lea.hbm %s2728_s7, 32 }
 0x2d0   : > { %p2308_p5 = scmp.ne.s32.totalorder %s2683_s10, %s2307_s13  ;;  %p2312_p8 = scmp.lt.s32.totalorder %s2683_s10, %s2728_s7 }
 0x2d1   : > { %p2313_p9 = scmp.lt.s32.totalorder %s2311_s22, %s2307_s13 }
 0x2d2   : > { %p2309_p6 = pnand %p2308_p5, %p2485_p10 }
 0x2d3   : > { %p2314_p12 = por %p2313_p9, %p2312_p8 }
 0x2d4   : > { %p2310_p7 = pneg %p2309_p6 }
 0x2d6   : > { %p2315_p11 = pnand %p2314_p12, %p2310_p7 }
 0x2d8   : > { %2318 = shalt.err (!%p2315_p11)
}
 0x2d9   : > { %2194 = dma.vmem_to_hbm [thread:$0]  (%p2485_p10), %s1631_s24, 16, %s2683_s10, %s1618_s12  }
 0x2da PF: > { %p2206_p13 = scmp.ge.s32.totalorder %s2395_s8, 2  ;;  %s1642_s27 = sand.u32 1, %s2383_s29  }
 0x2db   : > { %p2734_p0 = scmp.ne.s32.totalorder %s2731_s16, 0  ;;  %s1643_s28 = scalar_lea.sflag [#allocation8], %s1642_s27 }
 0x2dd   : > { %p2201_p1 = pnand %p2206_p13, %p2734_p0 }
 0x2df   : > { %p2202_p2 = pneg %p2201_p1 }
 0x2e1   : > { %2378 = dma.done.wait (%p2202_p2), %s1643_s28, 16  }
 0x2e2   : > { %2380 = vsyncadd (%p2202_p2), %s1643_s28, 4294967280  ;;  %p24_p3 = scmp.ge.s32.totalorder %s2472_s11, 4   ;;  %s2735_s29 = smov %s2387_s30 }
 0x2e3   : > { %s2736_s30 = smov %s2391_s0  ;;  %s2737_s0 = smov %s2483_s14 }
 0x2e4   : > { %s2738_s8 = smov %s2472_s11  ;;  %26 = sbr.rel (!%p24_p3) target bundleno = 19 (0x13), region = 870 }
 0x2e9   :  { %1647 = vsyncpa [#allocation7], 1 }
 0x2ea   :  { %1649 = vsyncpa [#allocation7 + $0x1], 1 }
 0x2eb   :  { %1650 = vsyncpa [#allocation8], 1 }
 0x2ec   :  { %1652 = vsyncpa [#allocation8 + $0x1], 1 }
 0x2ed   :  { %1653 = vsyncmov [#allocation3] }
 0x2f0   :  { %s1654_s8 = vpop.sfrf %1653 }
 0x2f1   :  { %p2065_p10 = scmp.ne.s32.totalorder %s1654_s8, 0 }
 0x2f3   :  { %1658 = shalt.err (%p2065_p10)  }
 0x2f4   :  { %1660 = vsyncmov [#allocation3 + $0x1] }
 0x2f7   :  { %s1661_s15 = vpop.sfrf %1660 }
 0x2f8   :  { %p2066_p4 = scmp.ne.s32.totalorder %s1661_s15, 0 }
 0x2fa   :  { %1665 = shalt.err (%p2066_p4)  }
 0x2fb   :  { %1667 = vsyncmov [#allocation3 + $0x2] }
 0x2fe   :  { %s1668_s16 = vpop.sfrf %1667 }
 0x2ff   :  { %p2067_p5 = scmp.ne.s32.totalorder %s1668_s16, 0 }
 0x301   :  { %1672 = shalt.err (%p2067_p5)  }
 0x302   :  { %1674 = vsyncmov [#allocation3 + $0x3] }
 0x305   :  { %s1675_s14 = vpop.sfrf %1674 }
 0x306   :  { %p2068_p6 = scmp.ne.s32.totalorder %s1675_s14, 0 }
 0x308   :  { %1679 = shalt.err (%p2068_p6)  }
 0x309   :  { %1681 = vsyncmov [#allocation3 + $0x4] }
 0x30c   :  { %s1682_s1 = vpop.sfrf %1681 }
 0x30d   :  { %p2069_p7 = scmp.ne.s32.totalorder %s1682_s1, 0 }
 0x30f   :  { %1686 = shalt.err (%p2069_p7)  }
 0x310   :  { %1688 = vsyncmov [#allocation3 + $0x5] }
 0x313   :  { %s1689_s2 = vpop.sfrf %1688 }
 0x314   :  { %p2070_p8 = scmp.ne.s32.totalorder %s1689_s2, 0 }
 0x316   :  { %1693 = shalt.err (%p2070_p8)  }
 0x317   :  { %1695 = vsyncmov [#allocation3 + $0x6] }
 0x31a   :  { %s1696_s3 = vpop.sfrf %1695 }
 0x31b   :  { %p2071_p9 = scmp.ne.s32.totalorder %s1696_s3, 0 }
 0x31d   :  { %1700 = shalt.err (%p2071_p9)  }
 0x31e   :  { %1702 = vsyncmov [#allocation3 + $0x7] }
 0x321   :  { %s1703_s4 = vpop.sfrf %1702 }
 0x322   :  { %p2072_p12 = scmp.ne.s32.totalorder %s1703_s4, 0 }
 0x324   :  { %1707 = shalt.err (%p2072_p12)  }
 0x325   :  { %1709 = vsyncmov [#allocation3 + $0x8] }
 0x328   :  { %s1710_s5 = vpop.sfrf %1709 }
 0x329   :  { %p2073_p11 = scmp.ne.s32.totalorder %s1710_s5, 0 }
 0x32b   :  { %1714 = shalt.err (%p2073_p11)  }
 0x32c   :  { %1716 = vsyncmov [#allocation3 + $0x9] }
 0x32f   :  { %s1717_s6 = vpop.sfrf %1716 }
 0x330   :  { %p2074_p13 = scmp.ne.s32.totalorder %s1717_s6, 0 }
 0x332   :  { %1721 = shalt.err (%p2074_p13)  }
 0x333   :  { %1723 = vsyncmov [#allocation3 + $0xa] }
 0x336   :  { %s1724_s7 = vpop.sfrf %1723 }
 0x337   :  { %p2075_p0 = scmp.ne.s32.totalorder %s1724_s7, 0 }
 0x339   :  { %1728 = shalt.err (%p2075_p0)  }
 0x33a   :  { %1730 = vsyncmov [#allocation3 + $0xb] }
 0x33d   :  { %s1731_s29 = vpop.sfrf %1730 }
 0x33e   :  { %p2076_p1 = scmp.ne.s32.totalorder %s1731_s29, 0 }
 0x340   :  { %1735 = shalt.err (%p2076_p1)  }
 0x341   :  { %1737 = vsyncmov [#allocation3 + $0xc] }
 0x344   :  { %s1738_s30 = vpop.sfrf %1737 }
 0x345   :  { %p2077_p2 = scmp.ne.s32.totalorder %s1738_s30, 0 }
 0x347   :  { %1742 = shalt.err (%p2077_p2)  }
 0x348   :  { %1744 = vsyncmov [#allocation3 + $0xd] }
 0x34b   :  { %s1745_s0 = vpop.sfrf %1744 }
 0x34c   :  { %p2078_p3 = scmp.ne.s32.totalorder %s1745_s0, 0 }
 0x34e   :  { %1749 = shalt.err (%p2078_p3)  }
 0x34f   :  { %1751 = vsyncmov [#allocation3 + $0xe] }
 0x352   :  { %s1752_s11 = vpop.sfrf %1751 }
 0x353   :  { %p2079_p10 = scmp.ne.s32.totalorder %s1752_s11, 0 }
 0x355   :  { %1756 = shalt.err (%p2079_p10)  }
 0x356   :  { %1758 = vsyncmov [#allocation3 + $0xf] }
 0x359   :  { %s1759_s24 = vpop.sfrf %1758 }
 0x35a   :  { %p2080_p4 = scmp.ne.s32.totalorder %s1759_s24, 0 }
 0x35c   :  { %1763 = shalt.err (%p2080_p4)  }
 0x35d   :  { %1765 = vsyncmov [#allocation3 + $0x10] }
 0x360   :  { %s1766_s10 = vpop.sfrf %1765 }
 0x361   :  { %p2081_p5 = scmp.ne.s32.totalorder %s1766_s10, 0 }
 0x363   :  { %1770 = shalt.err (%p2081_p5)  }
 0x364   :  { %1772 = vsyncmov [#allocation3 + $0x11] }
 0x367   :  { %s1773_s26 = vpop.sfrf %1772 }
 0x368   :  { %p2082_p6 = scmp.ne.s32.totalorder %s1773_s26, 0 }
 0x36a   :  { %1777 = shalt.err (%p2082_p6)  }

</bundles_post_ra>
